<compile_context>
chip_gen: v7x
topology: tpu7x:2x2x1
jax: 0.10.0
libtpu: 0.0.40
codegen_flags: <defaults>
</compile_context>

<pallas_src>
import math

import jax
import jax.numpy as jnp
from jax.experimental import pallas as pl
from jax.experimental.pallas import tpu as pltpu


PACK_W = 128  # lane width for padded weight columns, biases and the packed output row


def _pack_offsets(n_out, n_hid, max_length):
    """32-lane-aligned offsets for the packed output row [logp | h_new | attn_w]."""
    align = lambda v: ((v + 31) // 32) * 32
    h_off = align(n_out)
    a_off = align(h_off + n_hid)
    assert a_off + max_length <= PACK_W, "packed output row must fit in 128 lanes"
    return h_off, a_off


# ----------------------------------------------------------------------------- params
def init_params(key, n_hid, n_out, max_length):
    ks = jax.random.split(key, 11)

    def u(k, shape, fan_in):
        b = 1.0 / math.sqrt(fan_in)
        return jax.random.uniform(k, shape, jnp.float32, -b, b)

    return {
        "embedding": jax.random.normal(ks[0], (n_out, n_hid), jnp.float32),
        "attn_W": u(ks[1], (max_length, 2 * n_hid), 2 * n_hid),
        "attn_b": u(ks[2], (max_length,), 2 * n_hid),
        "comb_W": u(ks[3], (n_hid, 2 * n_hid), 2 * n_hid),
        "comb_b": u(ks[4], (n_hid,), 2 * n_hid),
        "W_ih": u(ks[5], (3 * n_hid, n_hid), n_hid),
        "W_hh": u(ks[6], (3 * n_hid, n_hid), n_hid),
        "b_ih": u(ks[7], (3 * n_hid,), n_hid),
        "b_hh": u(ks[8], (3 * n_hid,), n_hid),
        "out_W": u(ks[9], (n_out, n_hid), n_hid),
        "out_b": u(ks[10], (n_out,), n_hid),
    }


def prepare_params(p, n_hid, n_out, max_length):
    """One-time packing into kernel layout (hoisted out of the decode step)."""
    H, O, ML = n_hid, n_out, max_length
    f32, bf16 = jnp.float32, jnp.bfloat16
    assert H % 8 == 0
    assert 4 * H <= PACK_W, "fused GRU slab needs 4H lanes"
    assert O <= PACK_W and ML <= PACK_W and ML + H <= PACK_W
    _pack_offsets(O, H, ML)  # validate output packing

    def pad_cols(w):
        return jnp.pad(w.astype(f32), ((0, 0), (0, PACK_W - w.shape[1])))

    emb = p["embedding"].astype(f32)                              # (O, H)
    attn_We, attn_Wh = p["attn_W"][:, :H], p["attn_W"][:, H:]     # emb-half / hid-half
    comb_We, comb_Wh = p["comb_W"][:, :H], p["comb_W"][:, H:]

    # per-token precomputed halves (emb-dependent parts of attn & attn_combine), f32
    attn_tab = emb @ attn_We.T + p["attn_b"]                      # (O, ML)  incl. attn_b
    comb_tab = emb @ comb_We.T + p["comb_b"]                      # (O, H)   incl. comb_b
    tok_tab = jnp.zeros((O, PACK_W), f32)
    tok_tab = tok_tab.at[:, :ML].set(attn_tab)
    tok_tab = tok_tab.at[:, ML:ML + H].set(comb_tab)

    # K=H weight slab: [0] attn hidden-half, [1] output projection
    w_h = jnp.stack([pad_cols(attn_Wh.T),                         # cols [:ML]
                     pad_cols(p["out_W"].T)]).astype(bf16)        # cols [:O]  -> (2,H,128)

    # fused GRU slab (2H,128): cols[:3H]=[W_ih.T ; W_hh.T], cols[3H:4H]=[0 ; W_hh_n.T]
    w_gru = jnp.zeros((2 * H, PACK_W), f32)
    w_gru = w_gru.at[:H, :3 * H].set(p["W_ih"].T)
    w_gru = w_gru.at[H:, :3 * H].set(p["W_hh"].T)
    w_gru = w_gru.at[H:, 3 * H:4 * H].set(p["W_hh"][2 * H:, :].T)
    w_gru = w_gru.astype(bf16)

    bias_gru = jnp.zeros((PACK_W,), f32)
    bias_gru = bias_gru.at[:3 * H].set(p["b_ih"] + p["b_hh"])     # r,z,(n summed) gates
    bias_gru = bias_gru.at[3 * H:4 * H].set(p["b_hh"][2 * H:])    # gh_n bias
    bias_out = jnp.zeros((PACK_W,), f32).at[:O].set(p["out_b"])
    bias = jnp.stack([bias_gru, bias_out]).reshape(2, 1, PACK_W)

    return {"tok_tab": tok_tab, "w_h": w_h, "w_gru": w_gru, "bias": bias,
            "comb_Wh_T": comb_Wh.T.astype(f32)}   # (H,H): M = enc @ comb_Wh_T per call


# ----------------------------------------------------------------------------- pallas
def attn_decoder_decode(tokens, hid, encoder_outputs, packed, n_hid, n_out, max_length):
    """Teacher-forced T-step decode in ONE kernel launch (single grid point).

    tokens: (T,) int32; hid: (1,1,H); encoder_outputs: (ML,H).
    Returns logp (T,O), hidden-after-each-step (T,H), attn_weights (T,ML).
    """
    H, O, ML = n_hid, n_out, max_length
    T = int(tokens.shape[0])
    H_OFF, A_OFF = _pack_offsets(O, H, ML)
    f32, bf16 = jnp.float32, jnp.bfloat16

    tokens = tokens.astype(jnp.int32)
    hid2d = hid.reshape(1, H).astype(f32)
    enc = encoder_outputs.astype(f32)

    # loop-invariant over T (enc is constant across steps): hoisted out of the kernel
    m = enc @ packed["comb_Wh_T"]                                   # (ML, H)
    m_pad = jnp.pad(m, ((0, 0), (0, PACK_W - H))).astype(bf16)      # (ML, 128)

    def kernel(tok_ref,        # SMEM (T,) int32 (scalar prefetch)
               tok_tab_ref,    # (O,128)  f32  per-token [attn_half+b | comb_half+b | 0]
               w_h_ref,        # (2,H,128) bf16 [attn hidden-half | out_W.T]
               w_gru_ref,      # (2H,128)  bf16 fused GRU slab
               m_ref,          # (ML,128)  bf16 enc @ comb_W_h.T (padded)
               bias_ref,       # (2,1,128) f32  [gru bias | out bias]
               hid_ref,        # (1,H)     f32  initial hidden
               out_ref):       # (T,128)   f32  packed rows, one writeback DMA at the end
        # loop-invariant loads (weights stay in vregs/VMEM across all T steps)
        w_attn = w_h_ref[0]
        w_out = w_h_ref[1]
        w_gru = w_gru_ref[...]
        m_v = m_ref[...]
        bias_gru = bias_ref[0]
        bias_out = bias_ref[1]

        # TODO(synk): nn.Dropout(dropout_p) omitted (eval/inference mode -> identity).

        def step(t, h):                                         # h: (1,H) f32 carry
            tok = tok_ref[t]
            row = tok_tab_ref[pl.ds(tok, 1), :]                 # (1,128) gathered table row

            # attn_weights = softmax(emb_half + h @ attn_W_h.T + attn_b)
            ah = jnp.dot(h.astype(bf16), w_attn, preferred_element_type=f32)
            logits_a = row[:, :ML] + ah[:, :ML]
            mm = jnp.max(logits_a, axis=1, keepdims=True)
            e = jnp.exp(logits_a - mm)
            attn_w = e * pl.reciprocal(jnp.sum(e, axis=1, keepdims=True), approx=True)

            # x = relu(emb_half + attn_w @ M + comb_b)   (attn_applied folded into M)
            ch = jnp.dot(attn_w.astype(bf16), m_v, preferred_element_type=f32)
            x = jnp.maximum(row[:, ML:ML + H] + ch[:, :H], 0.0)

            # fused GRU: one dot gives gi+gh (cols :3H) and gh_n (cols 3H:4H)
            xh = jnp.concatenate([x, h], axis=1).astype(bf16)   # (1, 2H)
            g = jnp.dot(xh, w_gru, preferred_element_type=f32) + bias_gru
            r = jax.nn.sigmoid(g[:, :H])
            z = jax.nn.sigmoid(g[:, H:2 * H])
            gh_n = g[:, 3 * H:4 * H]
            gi_n = g[:, 2 * H:3 * H] - gh_n
            n = jnp.tanh(gi_n + r * gh_n)
            h_new = (1.0 - z) * n + z * h                       # (1, H) f32

            # logp = log_softmax(out(h_new))
            lo = jnp.dot(h_new.astype(bf16), w_out, preferred_element_type=f32) + bias_out
            logits = lo[:, :O]
            lm = jnp.max(logits, axis=1, keepdims=True)
            lse = jnp.log(jnp.sum(jnp.exp(logits - lm), axis=1, keepdims=True)) + lm
            logp = logits - lse

            # packed, 32-lane-aligned row: [logp@0 | h_new@H_OFF | attn_w@A_OFF | 0]
            parts = [logp,
                     jnp.zeros((1, H_OFF - O), f32),
                     h_new,
                     jnp.zeros((1, A_OFF - H_OFF - H), f32),
                     attn_w,
                     jnp.zeros((1, PACK_W - A_OFF - ML), f32)]
            out_ref[pl.ds(t, 1), :] = jnp.concatenate(
                [p_ for p_ in parts if p_.shape[1] > 0], axis=1)
            return h_new

        jax.lax.fori_loop(0, T, step, hid_ref[...], unroll=True)

    grid_spec = pltpu.PrefetchScalarGridSpec(
        num_scalar_prefetch=1,
        grid=(1,),
        in_specs=[
            pl.BlockSpec((O, PACK_W), lambda i, tok: (0, 0)),          # token tables
            pl.BlockSpec((2, H, PACK_W), lambda i, tok: (0, 0, 0)),    # K=H weights
            pl.BlockSpec((2 * H, PACK_W), lambda i, tok: (0, 0)),      # fused GRU slab
            pl.BlockSpec((ML, PACK_W), lambda i, tok: (0, 0)),         # enc-folded M
            pl.BlockSpec((2, 1, PACK_W), lambda i, tok: (0, 0, 0)),    # biases
            pl.BlockSpec((1, H), lambda i, tok: (0, 0)),               # initial hidden
        ],
        out_specs=pl.BlockSpec((T, PACK_W), lambda i, tok: (0, 0)),
    )

    packed_out = pl.pallas_call(
        kernel,
        grid_spec=grid_spec,
        out_shape=jax.ShapeDtypeStruct((T, PACK_W), jnp.float32),
        compiler_params=pltpu.CompilerParams(dimension_semantics=("arbitrary",)),
    )(tokens, packed["tok_tab"], packed["w_h"], packed["w_gru"], m_pad,
      packed["bias"], hid2d)

    logp = packed_out[:, :O]
    hids = packed_out[:, H_OFF:H_OFF + H]
    attn_w = packed_out[:, A_OFF:A_OFF + ML]
    return logp, hids, attn_w


def attn_decoder_forward(tok, hid, encoder_outputs, packed, n_hid, n_out, max_length):
    """Single-step call matching the PyTorch module: (logp (1,O), hid (1,1,H), attn_w (1,ML))."""
    logp, hids, attn_w = attn_decoder_decode(
        tok.reshape(1), hid, encoder_outputs, packed, n_hid, n_out, max_length)
    return logp, hids.reshape(1, 1, n_hid), attn_w


# ----------------------------------------------------------------------------- reference
def reference_forward(tok, hid, enc, p, n_hid):
    H = n_hid
    emb = p["embedding"][tok[0]][None, :]
    h = hid.reshape(1, H)
    x2 = jnp.concatenate([emb, h], axis=1)
    attn_w = jax.nn.softmax(x2 @ p["attn_W"].T + p["attn_b"], axis=1)
    attn_applied = attn_w @ enc
    x = jax.nn.relu(jnp.concatenate([emb, attn_applied], axis=1) @ p["comb_W"].T + p["comb_b"])
    gi = x @ p["W_ih"].T + p["b_ih"]
    gh = h @ p["W_hh"].T + p["b_hh"]
    r = jax.nn.sigmoid(gi[:, :H] + gh[:, :H])
    z = jax.nn.sigmoid(gi[:, H:2 * H] + gh[:, H:2 * H])
    n = jnp.tanh(gi[:, 2 * H:] + r * gh[:, 2 * H:])
    h_new = (1.0 - z) * n + z * h
    logp = jax.nn.log_softmax(h_new @ p["out_W"].T + p["out_b"], axis=1)
    return logp, h_new.reshape(1, 1, H), attn_w


# ----------------------------------------------------------------------------- main
if __name__ == "__main__":
    n_hid, n_out, max_length = 32, 40, 16
    T = 8  # teacher-forced decode steps fused into one kernel launch

    key = jax.random.PRNGKey(0)
    kp, kh, ke, kt = jax.random.split(key, 4)
    params = init_params(kp, n_hid, n_out, max_length)
    packed = prepare_params(params, n_hid, n_out, max_length)   # one-time weight packing

    tokens = jax.random.randint(kt, (T,), 0, n_out, dtype=jnp.int32)
    hid = jax.random.normal(kh, (1, 1, n_hid), jnp.float32)
    encoder_outputs = jax.random.normal(ke, (max_length, n_hid), jnp.float32)

    decode = jax.jit(attn_decoder_decode, static_argnums=(4, 5, 6))
    logp, hids, attn_w = decode(tokens, hid, encoder_outputs, packed,
                                n_hid, n_out, max_length)
    jax.block_until_ready((logp, hids, attn_w))

    # pure-JAX f32 reference (step-by-step loop)
    rh = hid
    ref_logp, ref_hid, ref_w = [], [], []
    for t in range(T):
        rl, rh, rw = reference_forward(tokens[t:t + 1], rh, encoder_outputs, params, n_hid)
        ref_logp.append(rl)
        ref_hid.append(rh.reshape(1, n_hid))
        ref_w.append(rw)
    ref_logp = jnp.concatenate(ref_logp, axis=0)
    ref_hid = jnp.concatenate(ref_hid, axis=0)
    ref_w = jnp.concatenate(ref_w, axis=0)

    # bf16 MXU inputs on the recurrent path -> loosened tolerances vs f32 reference
    # (drift compounds over the T=8 carried hidden state).
    assert jnp.allclose(logp, ref_logp, atol=1e-1, rtol=1e-1)
    assert jnp.allclose(hids, ref_hid, atol=1e-1, rtol=1e-1)
    assert jnp.allclose(attn_w, ref_w, atol=4e-2, rtol=4e-2)

    # single-step module-equivalent API (PyTorch forward shapes)
    l1, h1, w1 = attn_decoder_forward(tokens[0:1], hid, encoder_outputs, packed,
                                      n_hid, n_out, max_length)
    jax.block_until_ready((l1, h1, w1))
    assert l1.shape == (1, n_out) and h1.shape == (1, 1, n_hid) and w1.shape == (1, max_length)
    assert jnp.allclose(l1, ref_logp[0:1], atol=8e-2, rtol=8e-2)

    print("KERNEL_OK")
</pallas_src>

<mosaic_0001>
module attributes {stable_mosaic.version = 11 : i64} {
  func.func @kernel(%arg0: i32, %arg1: memref<8xi32, #tpu.memory_space<smem>>, %arg2: memref<40x128xf32, #tpu.memory_space<vmem>>, %arg3: memref<2x32x128xbf16, #tpu.memory_space<vmem>>, %arg4: memref<64x128xbf16, #tpu.memory_space<vmem>>, %arg5: memref<16x128xbf16, #tpu.memory_space<vmem>>, %arg6: memref<2x1x128xf32, #tpu.memory_space<vmem>>, %arg7: memref<1x32xf32, #tpu.memory_space<vmem>>, %arg8: memref<8x128xf32, #tpu.memory_space<vmem>>) attributes {dimension_semantics = [#tpu.dimension_semantics<arbitrary>], iteration_bounds = array<i64: 1>, scalar_prefetch = 1 : i64, scratch_operands = 0 : i64, tpu.core_type = #tpu.core_type<tc>, window_params = [{pipeline_mode = #tpu.pipeline_mode<synchronous>, transform_indices = @transform_0, window_bounds = array<i64: 40, 128>}, {pipeline_mode = #tpu.pipeline_mode<synchronous>, transform_indices = @transform_1, window_bounds = array<i64: 2, 32, 128>}, {pipeline_mode = #tpu.pipeline_mode<synchronous>, transform_indices = @transform_2, window_bounds = array<i64: 64, 128>}, {pipeline_mode = #tpu.pipeline_mode<synchronous>, transform_indices = @transform_3, window_bounds = array<i64: 16, 128>}, {pipeline_mode = #tpu.pipeline_mode<synchronous>, transform_indices = @transform_4, window_bounds = array<i64: 2, 1, 128>}, {pipeline_mode = #tpu.pipeline_mode<synchronous>, transform_indices = @transform_5, window_bounds = array<i64: 1, 32>}, {pipeline_mode = #tpu.pipeline_mode<synchronous>, transform_indices = @transform_6, window_bounds = array<i64: 8, 128>}]} {
    %c0 = arith.constant 0 : index
    %c0_0 = arith.constant 0 : index
    %c0_1 = arith.constant 0 : index
    %0 = vector.load %arg3[%c0, %c0_0, %c0_1] : memref<2x32x128xbf16, #tpu.memory_space<vmem>>, vector<1x32x128xbf16>
    %1 = vector.shape_cast %0 : vector<1x32x128xbf16> to vector<32x128xbf16>
    %c1 = arith.constant 1 : index
    %c0_2 = arith.constant 0 : index
    %c0_3 = arith.constant 0 : index
    %2 = vector.load %arg3[%c1, %c0_2, %c0_3] : memref<2x32x128xbf16, #tpu.memory_space<vmem>>, vector<1x32x128xbf16>
    %3 = vector.shape_cast %2 : vector<1x32x128xbf16> to vector<32x128xbf16>
    %c0_4 = arith.constant 0 : index
    %c0_5 = arith.constant 0 : index
    %4 = vector.load %arg4[%c0_4, %c0_5] : memref<64x128xbf16, #tpu.memory_space<vmem>>, vector<64x128xbf16>
    %c0_6 = arith.constant 0 : index
    %c0_7 = arith.constant 0 : index
    %5 = vector.load %arg5[%c0_6, %c0_7] : memref<16x128xbf16, #tpu.memory_space<vmem>>, vector<16x128xbf16>
    %c0_8 = arith.constant 0 : index
    %c0_9 = arith.constant 0 : index
    %c0_10 = arith.constant 0 : index
    %6 = vector.load %arg6[%c0_8, %c0_9, %c0_10] : memref<2x1x128xf32, #tpu.memory_space<vmem>>, vector<1x1x128xf32>
    %7 = vector.shape_cast %6 : vector<1x1x128xf32> to vector<1x128xf32>
    %c1_11 = arith.constant 1 : index
    %c0_12 = arith.constant 0 : index
    %c0_13 = arith.constant 0 : index
    %8 = vector.load %arg6[%c1_11, %c0_12, %c0_13] : memref<2x1x128xf32, #tpu.memory_space<vmem>>, vector<1x1x128xf32>
    %9 = vector.shape_cast %8 : vector<1x1x128xf32> to vector<1x128xf32>
    %c0_14 = arith.constant 0 : index
    %c0_15 = arith.constant 0 : index
    %10 = vector.load %arg7[%c0_14, %c0_15] : memref<1x32xf32, #tpu.memory_space<vmem>>, vector<1x32xf32>
    %c0_i32 = arith.constant 0 : i32
    %11 = arith.index_cast %c0_i32 : i32 to index
    %12 = memref.load %arg1[%11] : memref<8xi32, #tpu.memory_space<smem>>
    %13 = arith.index_cast %12 : i32 to index
    %c0_16 = arith.constant 0 : index
    %14 = vector.load %arg2[%13, %c0_16] : memref<40x128xf32, #tpu.memory_space<vmem>>, vector<1x128xf32>
    %15 = arith.truncf %10 : vector<1x32xf32> to vector<1x32xbf16>
    %cst = arith.constant dense<0.000000e+00> : vector<1x128xf32>
    %16 = tpu.matmul %15, %1, %cst {dimension_numbers = #tpu.dot_dimension_numbers<[1], [0], [0], [1], [0, 0, 1, 1], [], []>} : vector<1x32xbf16>, vector<32x128xbf16>, vector<1x128xf32> -> vector<1x128xf32>
    %17 = vector.extract_strided_slice %14 {offsets = [0, 0], sizes = [1, 16], strides = [1, 1]} : vector<1x128xf32> to vector<1x16xf32>
    %18 = vector.extract_strided_slice %16 {offsets = [0, 0], sizes = [1, 16], strides = [1, 1]} : vector<1x128xf32> to vector<1x16xf32>
    %19 = arith.addf %17, %18 : vector<1x16xf32>
    %cst_17 = arith.constant dense<0xFF800000> : vector<1xf32>
    %20 = vector.multi_reduction <maximumf>, %19, %cst_17 [1] : vector<1x16xf32> to vector<1xf32>
    %21 = vector.shape_cast %20 : vector<1xf32> to vector<1x1xf32>
    %22 = vector.broadcast %21 : vector<1x1xf32> to vector<1x16xf32>
    %23 = arith.subf %19, %22 : vector<1x16xf32>
    %24 = math.exp %23 : vector<1x16xf32>
    %cst_18 = arith.constant dense<0.000000e+00> : vector<1xf32>
    %25 = vector.multi_reduction <add>, %24, %cst_18 [1] : vector<1x16xf32> to vector<1xf32>
    %26 = vector.shape_cast %25 : vector<1xf32> to vector<1x1xf32>
    %27 = tpu.reciprocal %26 {approx = true} : vector<1x1xf32> -> vector<1x1xf32>
    %28 = vector.broadcast %27 : vector<1x1xf32> to vector<1x16xf32>
    %29 = arith.mulf %24, %28 : vector<1x16xf32>
    %30 = arith.truncf %29 : vector<1x16xf32> to vector<1x16xbf16>
    %cst_19 = arith.constant dense<0.000000e+00> : vector<1x128xf32>
    %31 = tpu.matmul %30, %5, %cst_19 {dimension_numbers = #tpu.dot_dimension_numbers<[1], [0], [0], [1], [0, 0, 1, 1], [], []>} : vector<1x16xbf16>, vector<16x128xbf16>, vector<1x128xf32> -> vector<1x128xf32>
    %32 = vector.extract_strided_slice %14 {offsets = [0, 16], sizes = [1, 32], strides = [1, 1]} : vector<1x128xf32> to vector<1x32xf32>
    %33 = vector.extract_strided_slice %31 {offsets = [0, 0], sizes = [1, 32], strides = [1, 1]} : vector<1x128xf32> to vector<1x32xf32>
    %34 = arith.addf %32, %33 : vector<1x32xf32>
    %cst_20 = arith.constant 0.000000e+00 : f32
    %35 = vector.broadcast %cst_20 : f32 to vector<1x32xf32>
    %36 = arith.maximumf %34, %35 : vector<1x32xf32>
    %37 = tpu.concatenate %36, %10 in 1 : vector<1x32xf32>, vector<1x32xf32> -> vector<1x64xf32>
    %38 = arith.truncf %37 : vector<1x64xf32> to vector<1x64xbf16>
    %cst_21 = arith.constant dense<0.000000e+00> : vector<1x128xf32>
    %39 = tpu.matmul %38, %4, %cst_21 {dimension_numbers = #tpu.dot_dimension_numbers<[1], [0], [0], [1], [0, 0, 1, 1], [], []>} : vector<1x64xbf16>, vector<64x128xbf16>, vector<1x128xf32> -> vector<1x128xf32>
    %40 = arith.addf %39, %7 : vector<1x128xf32>
    %41 = vector.extract_strided_slice %40 {offsets = [0, 0], sizes = [1, 32], strides = [1, 1]} : vector<1x128xf32> to vector<1x32xf32>
    %42 = arith.negf %41 : vector<1x32xf32>
    %43 = math.exp %42 : vector<1x32xf32>
    %cst_22 = arith.constant 1.000000e+00 : f32
    %44 = vector.broadcast %cst_22 : f32 to vector<1x32xf32>
    %45 = arith.addf %44, %43 : vector<1x32xf32>
    %46 = arith.divf %44, %45 : vector<1x32xf32>
    %47 = vector.extract_strided_slice %40 {offsets = [0, 32], sizes = [1, 32], strides = [1, 1]} : vector<1x128xf32> to vector<1x32xf32>
    %48 = arith.negf %47 : vector<1x32xf32>
    %49 = math.exp %48 : vector<1x32xf32>
    %cst_23 = arith.constant 1.000000e+00 : f32
    %50 = vector.broadcast %cst_23 : f32 to vector<1x32xf32>
    %51 = arith.addf %50, %49 : vector<1x32xf32>
    %52 = arith.divf %50, %51 : vector<1x32xf32>
    %53 = vector.extract_strided_slice %40 {offsets = [0, 96], sizes = [1, 32], strides = [1, 1]} : vector<1x128xf32> to vector<1x32xf32>
    %54 = vector.extract_strided_slice %40 {offsets = [0, 64], sizes = [1, 32], strides = [1, 1]} : vector<1x128xf32> to vector<1x32xf32>
    %55 = arith.subf %54, %53 : vector<1x32xf32>
    %56 = arith.mulf %46, %53 : vector<1x32xf32>
    %57 = arith.addf %55, %56 : vector<1x32xf32>
    %58 = math.tanh %57 : vector<1x32xf32>
    %cst_24 = arith.constant 1.000000e+00 : f32
    %59 = vector.broadcast %cst_24 : f32 to vector<1x32xf32>
    %60 = arith.subf %59, %52 : vector<1x32xf32>
    %61 = arith.mulf %60, %58 : vector<1x32xf32>
    %62 = arith.mulf %52, %10 : vector<1x32xf32>
    %63 = arith.addf %61, %62 : vector<1x32xf32>
    %64 = arith.truncf %63 : vector<1x32xf32> to vector<1x32xbf16>
    %cst_25 = arith.constant dense<0.000000e+00> : vector<1x128xf32>
    %65 = tpu.matmul %64, %3, %cst_25 {dimension_numbers = #tpu.dot_dimension_numbers<[1], [0], [0], [1], [0, 0, 1, 1], [], []>} : vector<1x32xbf16>, vector<32x128xbf16>, vector<1x128xf32> -> vector<1x128xf32>
    %66 = arith.addf %65, %9 : vector<1x128xf32>
    %67 = vector.extract_strided_slice %66 {offsets = [0, 0], sizes = [1, 40], strides = [1, 1]} : vector<1x128xf32> to vector<1x40xf32>
    %cst_26 = arith.constant dense<0xFF800000> : vector<1xf32>
    %68 = vector.multi_reduction <maximumf>, %67, %cst_26 [1] : vector<1x40xf32> to vector<1xf32>
    %69 = vector.shape_cast %68 : vector<1xf32> to vector<1x1xf32>
    %70 = vector.broadcast %69 : vector<1x1xf32> to vector<1x40xf32>
    %71 = arith.subf %67, %70 : vector<1x40xf32>
    %72 = math.exp %71 : vector<1x40xf32>
    %cst_27 = arith.constant dense<0.000000e+00> : vector<1xf32>
    %73 = vector.multi_reduction <add>, %72, %cst_27 [1] : vector<1x40xf32> to vector<1xf32>
    %74 = vector.shape_cast %73 : vector<1xf32> to vector<1x1xf32>
    %75 = math.log %74 : vector<1x1xf32>
    %76 = arith.addf %75, %69 : vector<1x1xf32>
    %77 = vector.broadcast %76 : vector<1x1xf32> to vector<1x40xf32>
    %78 = arith.subf %67, %77 : vector<1x40xf32>
    %cst_28 = arith.constant 0.000000e+00 : f32
    %79 = vector.broadcast %cst_28 : f32 to vector<1x24xf32>
    %cst_29 = arith.constant 0.000000e+00 : f32
    %80 = vector.broadcast %cst_29 : f32 to vector<1x16xf32>
    %81 = tpu.concatenate %78, %79, %63, %29, %80 in 1 : vector<1x40xf32>, vector<1x24xf32>, vector<1x32xf32>, vector<1x16xf32>, vector<1x16xf32> -> vector<1x128xf32>
    %82 = arith.index_cast %c0_i32 : i32 to index
    %c0_30 = arith.constant 0 : index
    %83 = vector.load %arg8[%82, %c0_30] : memref<8x128xf32, #tpu.memory_space<vmem>>, vector<1x128xf32>
    tpu.vector_store %arg8[%82, %c0_30], %81 {strides = array<i32>} : memref<8x128xf32, #tpu.memory_space<vmem>>, vector<1x128xf32>,
    %c1_i32 = arith.constant 1 : i32
    %84 = arith.index_cast %c1_i32 : i32 to index
    %85 = memref.load %arg1[%84] : memref<8xi32, #tpu.memory_space<smem>>
    %86 = arith.index_cast %85 : i32 to index
    %c0_31 = arith.constant 0 : index
    %87 = vector.load %arg2[%86, %c0_31] : memref<40x128xf32, #tpu.memory_space<vmem>>, vector<1x128xf32>
    %88 = arith.truncf %63 : vector<1x32xf32> to vector<1x32xbf16>
    %cst_32 = arith.constant dense<0.000000e+00> : vector<1x128xf32>
    %89 = tpu.matmul %88, %1, %cst_32 {dimension_numbers = #tpu.dot_dimension_numbers<[1], [0], [0], [1], [0, 0, 1, 1], [], []>} : vector<1x32xbf16>, vector<32x128xbf16>, vector<1x128xf32> -> vector<1x128xf32>
    %90 = vector.extract_strided_slice %87 {offsets = [0, 0], sizes = [1, 16], strides = [1, 1]} : vector<1x128xf32> to vector<1x16xf32>
    %91 = vector.extract_strided_slice %89 {offsets = [0, 0], sizes = [1, 16], strides = [1, 1]} : vector<1x128xf32> to vector<1x16xf32>
    %92 = arith.addf %90, %91 : vector<1x16xf32>
    %cst_33 = arith.constant dense<0xFF800000> : vector<1xf32>
    %93 = vector.multi_reduction <maximumf>, %92, %cst_33 [1] : vector<1x16xf32> to vector<1xf32>
    %94 = vector.shape_cast %93 : vector<1xf32> to vector<1x1xf32>
    %95 = vector.broadcast %94 : vector<1x1xf32> to vector<1x16xf32>
    %96 = arith.subf %92, %95 : vector<1x16xf32>
    %97 = math.exp %96 : vector<1x16xf32>
    %cst_34 = arith.constant dense<0.000000e+00> : vector<1xf32>
    %98 = vector.multi_reduction <add>, %97, %cst_34 [1] : vector<1x16xf32> to vector<1xf32>
    %99 = vector.shape_cast %98 : vector<1xf32> to vector<1x1xf32>
    %100 = tpu.reciprocal %99 {approx = true} : vector<1x1xf32> -> vector<1x1xf32>
    %101 = vector.broadcast %100 : vector<1x1xf32> to vector<1x16xf32>
    %102 = arith.mulf %97, %101 : vector<1x16xf32>
    %103 = arith.truncf %102 : vector<1x16xf32> to vector<1x16xbf16>
    %cst_35 = arith.constant dense<0.000000e+00> : vector<1x128xf32>
    %104 = tpu.matmul %103, %5, %cst_35 {dimension_numbers = #tpu.dot_dimension_numbers<[1], [0], [0], [1], [0, 0, 1, 1], [], []>} : vector<1x16xbf16>, vector<16x128xbf16>, vector<1x128xf32> -> vector<1x128xf32>
    %105 = vector.extract_strided_slice %87 {offsets = [0, 16], sizes = [1, 32], strides = [1, 1]} : vector<1x128xf32> to vector<1x32xf32>
    %106 = vector.extract_strided_slice %104 {offsets = [0, 0], sizes = [1, 32], strides = [1, 1]} : vector<1x128xf32> to vector<1x32xf32>
    %107 = arith.addf %105, %106 : vector<1x32xf32>
    %cst_36 = arith.constant 0.000000e+00 : f32
    %108 = vector.broadcast %cst_36 : f32 to vector<1x32xf32>
    %109 = arith.maximumf %107, %108 : vector<1x32xf32>
    %110 = tpu.concatenate %109, %63 in 1 : vector<1x32xf32>, vector<1x32xf32> -> vector<1x64xf32>
    %111 = arith.truncf %110 : vector<1x64xf32> to vector<1x64xbf16>
    %cst_37 = arith.constant dense<0.000000e+00> : vector<1x128xf32>
    %112 = tpu.matmul %111, %4, %cst_37 {dimension_numbers = #tpu.dot_dimension_numbers<[1], [0], [0], [1], [0, 0, 1, 1], [], []>} : vector<1x64xbf16>, vector<64x128xbf16>, vector<1x128xf32> -> vector<1x128xf32>
    %113 = arith.addf %112, %7 : vector<1x128xf32>
    %114 = vector.extract_strided_slice %113 {offsets = [0, 0], sizes = [1, 32], strides = [1, 1]} : vector<1x128xf32> to vector<1x32xf32>
    %115 = arith.negf %114 : vector<1x32xf32>
    %116 = math.exp %115 : vector<1x32xf32>
    %cst_38 = arith.constant 1.000000e+00 : f32
    %117 = vector.broadcast %cst_38 : f32 to vector<1x32xf32>
    %118 = arith.addf %117, %116 : vector<1x32xf32>
    %119 = arith.divf %117, %118 : vector<1x32xf32>
    %120 = vector.extract_strided_slice %113 {offsets = [0, 32], sizes = [1, 32], strides = [1, 1]} : vector<1x128xf32> to vector<1x32xf32>
    %121 = arith.negf %120 : vector<1x32xf32>
    %122 = math.exp %121 : vector<1x32xf32>
    %cst_39 = arith.constant 1.000000e+00 : f32
    %123 = vector.broadcast %cst_39 : f32 to vector<1x32xf32>
    %124 = arith.addf %123, %122 : vector<1x32xf32>
    %125 = arith.divf %123, %124 : vector<1x32xf32>
    %126 = vector.extract_strided_slice %113 {offsets = [0, 96], sizes = [1, 32], strides = [1, 1]} : vector<1x128xf32> to vector<1x32xf32>
    %127 = vector.extract_strided_slice %113 {offsets = [0, 64], sizes = [1, 32], strides = [1, 1]} : vector<1x128xf32> to vector<1x32xf32>
    %128 = arith.subf %127, %126 : vector<1x32xf32>
    %129 = arith.mulf %119, %126 : vector<1x32xf32>
    %130 = arith.addf %128, %129 : vector<1x32xf32>
    %131 = math.tanh %130 : vector<1x32xf32>
    %cst_40 = arith.constant 1.000000e+00 : f32
    %132 = vector.broadcast %cst_40 : f32 to vector<1x32xf32>
    %133 = arith.subf %132, %125 : vector<1x32xf32>
    %134 = arith.mulf %133, %131 : vector<1x32xf32>
    %135 = arith.mulf %125, %63 : vector<1x32xf32>
    %136 = arith.addf %134, %135 : vector<1x32xf32>
    %137 = arith.truncf %136 : vector<1x32xf32> to vector<1x32xbf16>
    %cst_41 = arith.constant dense<0.000000e+00> : vector<1x128xf32>
    %138 = tpu.matmul %137, %3, %cst_41 {dimension_numbers = #tpu.dot_dimension_numbers<[1], [0], [0], [1], [0, 0, 1, 1], [], []>} : vector<1x32xbf16>, vector<32x128xbf16>, vector<1x128xf32> -> vector<1x128xf32>
    %139 = arith.addf %138, %9 : vector<1x128xf32>
    %140 = vector.extract_strided_slice %139 {offsets = [0, 0], sizes = [1, 40], strides = [1, 1]} : vector<1x128xf32> to vector<1x40xf32>
    %cst_42 = arith.constant dense<0xFF800000> : vector<1xf32>
    %141 = vector.multi_reduction <maximumf>, %140, %cst_42 [1] : vector<1x40xf32> to vector<1xf32>
    %142 = vector.shape_cast %141 : vector<1xf32> to vector<1x1xf32>
    %143 = vector.broadcast %142 : vector<1x1xf32> to vector<1x40xf32>
    %144 = arith.subf %140, %143 : vector<1x40xf32>
    %145 = math.exp %144 : vector<1x40xf32>
    %cst_43 = arith.constant dense<0.000000e+00> : vector<1xf32>
    %146 = vector.multi_reduction <add>, %145, %cst_43 [1] : vector<1x40xf32> to vector<1xf32>
    %147 = vector.shape_cast %146 : vector<1xf32> to vector<1x1xf32>
    %148 = math.log %147 : vector<1x1xf32>
    %149 = arith.addf %148, %142 : vector<1x1xf32>
    %150 = vector.broadcast %149 : vector<1x1xf32> to vector<1x40xf32>
    %151 = arith.subf %140, %150 : vector<1x40xf32>
    %cst_44 = arith.constant 0.000000e+00 : f32
    %152 = vector.broadcast %cst_44 : f32 to vector<1x24xf32>
    %cst_45 = arith.constant 0.000000e+00 : f32
    %153 = vector.broadcast %cst_45 : f32 to vector<1x16xf32>
    %154 = tpu.concatenate %151, %152, %136, %102, %153 in 1 : vector<1x40xf32>, vector<1x24xf32>, vector<1x32xf32>, vector<1x16xf32>, vector<1x16xf32> -> vector<1x128xf32>
    %155 = arith.index_cast %c1_i32 : i32 to index
    %c0_46 = arith.constant 0 : index
    %156 = vector.load %arg8[%155, %c0_46] : memref<8x128xf32, #tpu.memory_space<vmem>>, vector<1x128xf32>
    tpu.vector_store %arg8[%155, %c0_46], %154 {strides = array<i32>} : memref<8x128xf32, #tpu.memory_space<vmem>>, vector<1x128xf32>,
    %c2_i32 = arith.constant 2 : i32
    %157 = arith.index_cast %c2_i32 : i32 to index
    %158 = memref.load %arg1[%157] : memref<8xi32, #tpu.memory_space<smem>>
    %159 = arith.index_cast %158 : i32 to index
    %c0_47 = arith.constant 0 : index
    %160 = vector.load %arg2[%159, %c0_47] : memref<40x128xf32, #tpu.memory_space<vmem>>, vector<1x128xf32>
    %161 = arith.truncf %136 : vector<1x32xf32> to vector<1x32xbf16>
    %cst_48 = arith.constant dense<0.000000e+00> : vector<1x128xf32>
    %162 = tpu.matmul %161, %1, %cst_48 {dimension_numbers = #tpu.dot_dimension_numbers<[1], [0], [0], [1], [0, 0, 1, 1], [], []>} : vector<1x32xbf16>, vector<32x128xbf16>, vector<1x128xf32> -> vector<1x128xf32>
    %163 = vector.extract_strided_slice %160 {offsets = [0, 0], sizes = [1, 16], strides = [1, 1]} : vector<1x128xf32> to vector<1x16xf32>
    %164 = vector.extract_strided_slice %162 {offsets = [0, 0], sizes = [1, 16], strides = [1, 1]} : vector<1x128xf32> to vector<1x16xf32>
    %165 = arith.addf %163, %164 : vector<1x16xf32>
    %cst_49 = arith.constant dense<0xFF800000> : vector<1xf32>
    %166 = vector.multi_reduction <maximumf>, %165, %cst_49 [1] : vector<1x16xf32> to vector<1xf32>
    %167 = vector.shape_cast %166 : vector<1xf32> to vector<1x1xf32>
    %168 = vector.broadcast %167 : vector<1x1xf32> to vector<1x16xf32>
    %169 = arith.subf %165, %168 : vector<1x16xf32>
    %170 = math.exp %169 : vector<1x16xf32>
    %cst_50 = arith.constant dense<0.000000e+00> : vector<1xf32>
    %171 = vector.multi_reduction <add>, %170, %cst_50 [1] : vector<1x16xf32> to vector<1xf32>
    %172 = vector.shape_cast %171 : vector<1xf32> to vector<1x1xf32>
    %173 = tpu.reciprocal %172 {approx = true} : vector<1x1xf32> -> vector<1x1xf32>
    %174 = vector.broadcast %173 : vector<1x1xf32> to vector<1x16xf32>
    %175 = arith.mulf %170, %174 : vector<1x16xf32>
    %176 = arith.truncf %175 : vector<1x16xf32> to vector<1x16xbf16>
    %cst_51 = arith.constant dense<0.000000e+00> : vector<1x128xf32>
    %177 = tpu.matmul %176, %5, %cst_51 {dimension_numbers = #tpu.dot_dimension_numbers<[1], [0], [0], [1], [0, 0, 1, 1], [], []>} : vector<1x16xbf16>, vector<16x128xbf16>, vector<1x128xf32> -> vector<1x128xf32>
    %178 = vector.extract_strided_slice %160 {offsets = [0, 16], sizes = [1, 32], strides = [1, 1]} : vector<1x128xf32> to vector<1x32xf32>
    %179 = vector.extract_strided_slice %177 {offsets = [0, 0], sizes = [1, 32], strides = [1, 1]} : vector<1x128xf32> to vector<1x32xf32>
    %180 = arith.addf %178, %179 : vector<1x32xf32>
    %cst_52 = arith.constant 0.000000e+00 : f32
    %181 = vector.broadcast %cst_52 : f32 to vector<1x32xf32>
    %182 = arith.maximumf %180, %181 : vector<1x32xf32>
    %183 = tpu.concatenate %182, %136 in 1 : vector<1x32xf32>, vector<1x32xf32> -> vector<1x64xf32>
    %184 = arith.truncf %183 : vector<1x64xf32> to vector<1x64xbf16>
    %cst_53 = arith.constant dense<0.000000e+00> : vector<1x128xf32>
    %185 = tpu.matmul %184, %4, %cst_53 {dimension_numbers = #tpu.dot_dimension_numbers<[1], [0], [0], [1], [0, 0, 1, 1], [], []>} : vector<1x64xbf16>, vector<64x128xbf16>, vector<1x128xf32> -> vector<1x128xf32>
    %186 = arith.addf %185, %7 : vector<1x128xf32>
    %187 = vector.extract_strided_slice %186 {offsets = [0, 0], sizes = [1, 32], strides = [1, 1]} : vector<1x128xf32> to vector<1x32xf32>
    %188 = arith.negf %187 : vector<1x32xf32>
    %189 = math.exp %188 : vector<1x32xf32>
    %cst_54 = arith.constant 1.000000e+00 : f32
    %190 = vector.broadcast %cst_54 : f32 to vector<1x32xf32>
    %191 = arith.addf %190, %189 : vector<1x32xf32>
    %192 = arith.divf %190, %191 : vector<1x32xf32>
    %193 = vector.extract_strided_slice %186 {offsets = [0, 32], sizes = [1, 32], strides = [1, 1]} : vector<1x128xf32> to vector<1x32xf32>
    %194 = arith.negf %193 : vector<1x32xf32>
    %195 = math.exp %194 : vector<1x32xf32>
    %cst_55 = arith.constant 1.000000e+00 : f32
    %196 = vector.broadcast %cst_55 : f32 to vector<1x32xf32>
    %197 = arith.addf %196, %195 : vector<1x32xf32>
    %198 = arith.divf %196, %197 : vector<1x32xf32>
    %199 = vector.extract_strided_slice %186 {offsets = [0, 96], sizes = [1, 32], strides = [1, 1]} : vector<1x128xf32> to vector<1x32xf32>
    %200 = vector.extract_strided_slice %186 {offsets = [0, 64], sizes = [1, 32], strides = [1, 1]} : vector<1x128xf32> to vector<1x32xf32>
    %201 = arith.subf %200, %199 : vector<1x32xf32>
    %202 = arith.mulf %192, %199 : vector<1x32xf32>
    %203 = arith.addf %201, %202 : vector<1x32xf32>
    %204 = math.tanh %203 : vector<1x32xf32>
    %cst_56 = arith.constant 1.000000e+00 : f32
    %205 = vector.broadcast %cst_56 : f32 to vector<1x32xf32>
    %206 = arith.subf %205, %198 : vector<1x32xf32>
    %207 = arith.mulf %206, %204 : vector<1x32xf32>
    %208 = arith.mulf %198, %136 : vector<1x32xf32>
    %209 = arith.addf %207, %208 : vector<1x32xf32>
    %210 = arith.truncf %209 : vector<1x32xf32> to vector<1x32xbf16>
    %cst_57 = arith.constant dense<0.000000e+00> : vector<1x128xf32>
    %211 = tpu.matmul %210, %3, %cst_57 {dimension_numbers = #tpu.dot_dimension_numbers<[1], [0], [0], [1], [0, 0, 1, 1], [], []>} : vector<1x32xbf16>, vector<32x128xbf16>, vector<1x128xf32> -> vector<1x128xf32>
    %212 = arith.addf %211, %9 : vector<1x128xf32>
    %213 = vector.extract_strided_slice %212 {offsets = [0, 0], sizes = [1, 40], strides = [1, 1]} : vector<1x128xf32> to vector<1x40xf32>
    %cst_58 = arith.constant dense<0xFF800000> : vector<1xf32>
    %214 = vector.multi_reduction <maximumf>, %213, %cst_58 [1] : vector<1x40xf32> to vector<1xf32>
    %215 = vector.shape_cast %214 : vector<1xf32> to vector<1x1xf32>
    %216 = vector.broadcast %215 : vector<1x1xf32> to vector<1x40xf32>
    %217 = arith.subf %213, %216 : vector<1x40xf32>
    %218 = math.exp %217 : vector<1x40xf32>
    %cst_59 = arith.constant dense<0.000000e+00> : vector<1xf32>
    %219 = vector.multi_reduction <add>, %218, %cst_59 [1] : vector<1x40xf32> to vector<1xf32>
    %220 = vector.shape_cast %219 : vector<1xf32> to vector<1x1xf32>
    %221 = math.log %220 : vector<1x1xf32>
    %222 = arith.addf %221, %215 : vector<1x1xf32>
    %223 = vector.broadcast %222 : vector<1x1xf32> to vector<1x40xf32>
    %224 = arith.subf %213, %223 : vector<1x40xf32>
    %cst_60 = arith.constant 0.000000e+00 : f32
    %225 = vector.broadcast %cst_60 : f32 to vector<1x24xf32>
    %cst_61 = arith.constant 0.000000e+00 : f32
    %226 = vector.broadcast %cst_61 : f32 to vector<1x16xf32>
    %227 = tpu.concatenate %224, %225, %209, %175, %226 in 1 : vector<1x40xf32>, vector<1x24xf32>, vector<1x32xf32>, vector<1x16xf32>, vector<1x16xf32> -> vector<1x128xf32>
    %228 = arith.index_cast %c2_i32 : i32 to index
    %c0_62 = arith.constant 0 : index
    %229 = vector.load %arg8[%228, %c0_62] : memref<8x128xf32, #tpu.memory_space<vmem>>, vector<1x128xf32>
    tpu.vector_store %arg8[%228, %c0_62], %227 {strides = array<i32>} : memref<8x128xf32, #tpu.memory_space<vmem>>, vector<1x128xf32>,
    %c3_i32 = arith.constant 3 : i32
    %230 = arith.index_cast %c3_i32 : i32 to index
    %231 = memref.load %arg1[%230] : memref<8xi32, #tpu.memory_space<smem>>
    %232 = arith.index_cast %231 : i32 to index
    %c0_63 = arith.constant 0 : index
    %233 = vector.load %arg2[%232, %c0_63] : memref<40x128xf32, #tpu.memory_space<vmem>>, vector<1x128xf32>
    %234 = arith.truncf %209 : vector<1x32xf32> to vector<1x32xbf16>
    %cst_64 = arith.constant dense<0.000000e+00> : vector<1x128xf32>
    %235 = tpu.matmul %234, %1, %cst_64 {dimension_numbers = #tpu.dot_dimension_numbers<[1], [0], [0], [1], [0, 0, 1, 1], [], []>} : vector<1x32xbf16>, vector<32x128xbf16>, vector<1x128xf32> -> vector<1x128xf32>
    %236 = vector.extract_strided_slice %233 {offsets = [0, 0], sizes = [1, 16], strides = [1, 1]} : vector<1x128xf32> to vector<1x16xf32>
    %237 = vector.extract_strided_slice %235 {offsets = [0, 0], sizes = [1, 16], strides = [1, 1]} : vector<1x128xf32> to vector<1x16xf32>
    %238 = arith.addf %236, %237 : vector<1x16xf32>
    %cst_65 = arith.constant dense<0xFF800000> : vector<1xf32>
    %239 = vector.multi_reduction <maximumf>, %238, %cst_65 [1] : vector<1x16xf32> to vector<1xf32>
    %240 = vector.shape_cast %239 : vector<1xf32> to vector<1x1xf32>
    %241 = vector.broadcast %240 : vector<1x1xf32> to vector<1x16xf32>
    %242 = arith.subf %238, %241 : vector<1x16xf32>
    %243 = math.exp %242 : vector<1x16xf32>
    %cst_66 = arith.constant dense<0.000000e+00> : vector<1xf32>
    %244 = vector.multi_reduction <add>, %243, %cst_66 [1] : vector<1x16xf32> to vector<1xf32>
    %245 = vector.shape_cast %244 : vector<1xf32> to vector<1x1xf32>
    %246 = tpu.reciprocal %245 {approx = true} : vector<1x1xf32> -> vector<1x1xf32>
    %247 = vector.broadcast %246 : vector<1x1xf32> to vector<1x16xf32>
    %248 = arith.mulf %243, %247 : vector<1x16xf32>
    %249 = arith.truncf %248 : vector<1x16xf32> to vector<1x16xbf16>
    %cst_67 = arith.constant dense<0.000000e+00> : vector<1x128xf32>
    %250 = tpu.matmul %249, %5, %cst_67 {dimension_numbers = #tpu.dot_dimension_numbers<[1], [0], [0], [1], [0, 0, 1, 1], [], []>} : vector<1x16xbf16>, vector<16x128xbf16>, vector<1x128xf32> -> vector<1x128xf32>
    %251 = vector.extract_strided_slice %233 {offsets = [0, 16], sizes = [1, 32], strides = [1, 1]} : vector<1x128xf32> to vector<1x32xf32>
    %252 = vector.extract_strided_slice %250 {offsets = [0, 0], sizes = [1, 32], strides = [1, 1]} : vector<1x128xf32> to vector<1x32xf32>
    %253 = arith.addf %251, %252 : vector<1x32xf32>
    %cst_68 = arith.constant 0.000000e+00 : f32
    %254 = vector.broadcast %cst_68 : f32 to vector<1x32xf32>
    %255 = arith.maximumf %253, %254 : vector<1x32xf32>
    %256 = tpu.concatenate %255, %209 in 1 : vector<1x32xf32>, vector<1x32xf32> -> vector<1x64xf32>
    %257 = arith.truncf %256 : vector<1x64xf32> to vector<1x64xbf16>
    %cst_69 = arith.constant dense<0.000000e+00> : vector<1x128xf32>
    %258 = tpu.matmul %257, %4, %cst_69 {dimension_numbers = #tpu.dot_dimension_numbers<[1], [0], [0], [1], [0, 0, 1, 1], [], []>} : vector<1x64xbf16>, vector<64x128xbf16>, vector<1x128xf32> -> vector<1x128xf32>
    %259 = arith.addf %258, %7 : vector<1x128xf32>
    %260 = vector.extract_strided_slice %259 {offsets = [0, 0], sizes = [1, 32], strides = [1, 1]} : vector<1x128xf32> to vector<1x32xf32>
    %261 = arith.negf %260 : vector<1x32xf32>
    %262 = math.exp %261 : vector<1x32xf32>
    %cst_70 = arith.constant 1.000000e+00 : f32
    %263 = vector.broadcast %cst_70 : f32 to vector<1x32xf32>
    %264 = arith.addf %263, %262 : vector<1x32xf32>
    %265 = arith.divf %263, %264 : vector<1x32xf32>
    %266 = vector.extract_strided_slice %259 {offsets = [0, 32], sizes = [1, 32], strides = [1, 1]} : vector<1x128xf32> to vector<1x32xf32>
    %267 = arith.negf %266 : vector<1x32xf32>
    %268 = math.exp %267 : vector<1x32xf32>
    %cst_71 = arith.constant 1.000000e+00 : f32
    %269 = vector.broadcast %cst_71 : f32 to vector<1x32xf32>
    %270 = arith.addf %269, %268 : vector<1x32xf32>
    %271 = arith.divf %269, %270 : vector<1x32xf32>
    %272 = vector.extract_strided_slice %259 {offsets = [0, 96], sizes = [1, 32], strides = [1, 1]} : vector<1x128xf32> to vector<1x32xf32>
    %273 = vector.extract_strided_slice %259 {offsets = [0, 64], sizes = [1, 32], strides = [1, 1]} : vector<1x128xf32> to vector<1x32xf32>
    %274 = arith.subf %273, %272 : vector<1x32xf32>
    %275 = arith.mulf %265, %272 : vector<1x32xf32>
    %276 = arith.addf %274, %275 : vector<1x32xf32>
    %277 = math.tanh %276 : vector<1x32xf32>
    %cst_72 = arith.constant 1.000000e+00 : f32
    %278 = vector.broadcast %cst_72 : f32 to vector<1x32xf32>
    %279 = arith.subf %278, %271 : vector<1x32xf32>
    %280 = arith.mulf %279, %277 : vector<1x32xf32>
    %281 = arith.mulf %271, %209 : vector<1x32xf32>
    %282 = arith.addf %280, %281 : vector<1x32xf32>
    %283 = arith.truncf %282 : vector<1x32xf32> to vector<1x32xbf16>
    %cst_73 = arith.constant dense<0.000000e+00> : vector<1x128xf32>
    %284 = tpu.matmul %283, %3, %cst_73 {dimension_numbers = #tpu.dot_dimension_numbers<[1], [0], [0], [1], [0, 0, 1, 1], [], []>} : vector<1x32xbf16>, vector<32x128xbf16>, vector<1x128xf32> -> vector<1x128xf32>
    %285 = arith.addf %284, %9 : vector<1x128xf32>
    %286 = vector.extract_strided_slice %285 {offsets = [0, 0], sizes = [1, 40], strides = [1, 1]} : vector<1x128xf32> to vector<1x40xf32>
    %cst_74 = arith.constant dense<0xFF800000> : vector<1xf32>
    %287 = vector.multi_reduction <maximumf>, %286, %cst_74 [1] : vector<1x40xf32> to vector<1xf32>
    %288 = vector.shape_cast %287 : vector<1xf32> to vector<1x1xf32>
    %289 = vector.broadcast %288 : vector<1x1xf32> to vector<1x40xf32>
    %290 = arith.subf %286, %289 : vector<1x40xf32>
    %291 = math.exp %290 : vector<1x40xf32>
    %cst_75 = arith.constant dense<0.000000e+00> : vector<1xf32>
    %292 = vector.multi_reduction <add>, %291, %cst_75 [1] : vector<1x40xf32> to vector<1xf32>
    %293 = vector.shape_cast %292 : vector<1xf32> to vector<1x1xf32>
    %294 = math.log %293 : vector<1x1xf32>
    %295 = arith.addf %294, %288 : vector<1x1xf32>
    %296 = vector.broadcast %295 : vector<1x1xf32> to vector<1x40xf32>
    %297 = arith.subf %286, %296 : vector<1x40xf32>
    %cst_76 = arith.constant 0.000000e+00 : f32
    %298 = vector.broadcast %cst_76 : f32 to vector<1x24xf32>
    %cst_77 = arith.constant 0.000000e+00 : f32
    %299 = vector.broadcast %cst_77 : f32 to vector<1x16xf32>
    %300 = tpu.concatenate %297, %298, %282, %248, %299 in 1 : vector<1x40xf32>, vector<1x24xf32>, vector<1x32xf32>, vector<1x16xf32>, vector<1x16xf32> -> vector<1x128xf32>
    %301 = arith.index_cast %c3_i32 : i32 to index
    %c0_78 = arith.constant 0 : index
    %302 = vector.load %arg8[%301, %c0_78] : memref<8x128xf32, #tpu.memory_space<vmem>>, vector<1x128xf32>
    tpu.vector_store %arg8[%301, %c0_78], %300 {strides = array<i32>} : memref<8x128xf32, #tpu.memory_space<vmem>>, vector<1x128xf32>,
    %c4_i32 = arith.constant 4 : i32
    %303 = arith.index_cast %c4_i32 : i32 to index
    %304 = memref.load %arg1[%303] : memref<8xi32, #tpu.memory_space<smem>>
    %305 = arith.index_cast %304 : i32 to index
    %c0_79 = arith.constant 0 : index
    %306 = vector.load %arg2[%305, %c0_79] : memref<40x128xf32, #tpu.memory_space<vmem>>, vector<1x128xf32>
    %307 = arith.truncf %282 : vector<1x32xf32> to vector<1x32xbf16>
    %cst_80 = arith.constant dense<0.000000e+00> : vector<1x128xf32>
    %308 = tpu.matmul %307, %1, %cst_80 {dimension_numbers = #tpu.dot_dimension_numbers<[1], [0], [0], [1], [0, 0, 1, 1], [], []>} : vector<1x32xbf16>, vector<32x128xbf16>, vector<1x128xf32> -> vector<1x128xf32>
    %309 = vector.extract_strided_slice %306 {offsets = [0, 0], sizes = [1, 16], strides = [1, 1]} : vector<1x128xf32> to vector<1x16xf32>
    %310 = vector.extract_strided_slice %308 {offsets = [0, 0], sizes = [1, 16], strides = [1, 1]} : vector<1x128xf32> to vector<1x16xf32>
    %311 = arith.addf %309, %310 : vector<1x16xf32>
    %cst_81 = arith.constant dense<0xFF800000> : vector<1xf32>
    %312 = vector.multi_reduction <maximumf>, %311, %cst_81 [1] : vector<1x16xf32> to vector<1xf32>
    %313 = vector.shape_cast %312 : vector<1xf32> to vector<1x1xf32>
    %314 = vector.broadcast %313 : vector<1x1xf32> to vector<1x16xf32>
    %315 = arith.subf %311, %314 : vector<1x16xf32>
    %316 = math.exp %315 : vector<1x16xf32>
    %cst_82 = arith.constant dense<0.000000e+00> : vector<1xf32>
    %317 = vector.multi_reduction <add>, %316, %cst_82 [1] : vector<1x16xf32> to vector<1xf32>
    %318 = vector.shape_cast %317 : vector<1xf32> to vector<1x1xf32>
    %319 = tpu.reciprocal %318 {approx = true} : vector<1x1xf32> -> vector<1x1xf32>
    %320 = vector.broadcast %319 : vector<1x1xf32> to vector<1x16xf32>
    %321 = arith.mulf %316, %320 : vector<1x16xf32>
    %322 = arith.truncf %321 : vector<1x16xf32> to vector<1x16xbf16>
    %cst_83 = arith.constant dense<0.000000e+00> : vector<1x128xf32>
    %323 = tpu.matmul %322, %5, %cst_83 {dimension_numbers = #tpu.dot_dimension_numbers<[1], [0], [0], [1], [0, 0, 1, 1], [], []>} : vector<1x16xbf16>, vector<16x128xbf16>, vector<1x128xf32> -> vector<1x128xf32>
    %324 = vector.extract_strided_slice %306 {offsets = [0, 16], sizes = [1, 32], strides = [1, 1]} : vector<1x128xf32> to vector<1x32xf32>
    %325 = vector.extract_strided_slice %323 {offsets = [0, 0], sizes = [1, 32], strides = [1, 1]} : vector<1x128xf32> to vector<1x32xf32>
    %326 = arith.addf %324, %325 : vector<1x32xf32>
    %cst_84 = arith.constant 0.000000e+00 : f32
    %327 = vector.broadcast %cst_84 : f32 to vector<1x32xf32>
    %328 = arith.maximumf %326, %327 : vector<1x32xf32>
    %329 = tpu.concatenate %328, %282 in 1 : vector<1x32xf32>, vector<1x32xf32> -> vector<1x64xf32>
    %330 = arith.truncf %329 : vector<1x64xf32> to vector<1x64xbf16>
    %cst_85 = arith.constant dense<0.000000e+00> : vector<1x128xf32>
    %331 = tpu.matmul %330, %4, %cst_85 {dimension_numbers = #tpu.dot_dimension_numbers<[1], [0], [0], [1], [0, 0, 1, 1], [], []>} : vector<1x64xbf16>, vector<64x128xbf16>, vector<1x128xf32> -> vector<1x128xf32>
    %332 = arith.addf %331, %7 : vector<1x128xf32>
    %333 = vector.extract_strided_slice %332 {offsets = [0, 0], sizes = [1, 32], strides = [1, 1]} : vector<1x128xf32> to vector<1x32xf32>
    %334 = arith.negf %333 : vector<1x32xf32>
    %335 = math.exp %334 : vector<1x32xf32>
    %cst_86 = arith.constant 1.000000e+00 : f32
    %336 = vector.broadcast %cst_86 : f32 to vector<1x32xf32>
    %337 = arith.addf %336, %335 : vector<1x32xf32>
    %338 = arith.divf %336, %337 : vector<1x32xf32>
    %339 = vector.extract_strided_slice %332 {offsets = [0, 32], sizes = [1, 32], strides = [1, 1]} : vector<1x128xf32> to vector<1x32xf32>
    %340 = arith.negf %339 : vector<1x32xf32>
    %341 = math.exp %340 : vector<1x32xf32>
    %cst_87 = arith.constant 1.000000e+00 : f32
    %342 = vector.broadcast %cst_87 : f32 to vector<1x32xf32>
    %343 = arith.addf %342, %341 : vector<1x32xf32>
    %344 = arith.divf %342, %343 : vector<1x32xf32>
    %345 = vector.extract_strided_slice %332 {offsets = [0, 96], sizes = [1, 32], strides = [1, 1]} : vector<1x128xf32> to vector<1x32xf32>
    %346 = vector.extract_strided_slice %332 {offsets = [0, 64], sizes = [1, 32], strides = [1, 1]} : vector<1x128xf32> to vector<1x32xf32>
    %347 = arith.subf %346, %345 : vector<1x32xf32>
    %348 = arith.mulf %338, %345 : vector<1x32xf32>
    %349 = arith.addf %347, %348 : vector<1x32xf32>
    %350 = math.tanh %349 : vector<1x32xf32>
    %cst_88 = arith.constant 1.000000e+00 : f32
    %351 = vector.broadcast %cst_88 : f32 to vector<1x32xf32>
    %352 = arith.subf %351, %344 : vector<1x32xf32>
    %353 = arith.mulf %352, %350 : vector<1x32xf32>
    %354 = arith.mulf %344, %282 : vector<1x32xf32>
    %355 = arith.addf %353, %354 : vector<1x32xf32>
    %356 = arith.truncf %355 : vector<1x32xf32> to vector<1x32xbf16>
    %cst_89 = arith.constant dense<0.000000e+00> : vector<1x128xf32>
    %357 = tpu.matmul %356, %3, %cst_89 {dimension_numbers = #tpu.dot_dimension_numbers<[1], [0], [0], [1], [0, 0, 1, 1], [], []>} : vector<1x32xbf16>, vector<32x128xbf16>, vector<1x128xf32> -> vector<1x128xf32>
    %358 = arith.addf %357, %9 : vector<1x128xf32>
    %359 = vector.extract_strided_slice %358 {offsets = [0, 0], sizes = [1, 40], strides = [1, 1]} : vector<1x128xf32> to vector<1x40xf32>
    %cst_90 = arith.constant dense<0xFF800000> : vector<1xf32>
    %360 = vector.multi_reduction <maximumf>, %359, %cst_90 [1] : vector<1x40xf32> to vector<1xf32>
    %361 = vector.shape_cast %360 : vector<1xf32> to vector<1x1xf32>
    %362 = vector.broadcast %361 : vector<1x1xf32> to vector<1x40xf32>
    %363 = arith.subf %359, %362 : vector<1x40xf32>
    %364 = math.exp %363 : vector<1x40xf32>
    %cst_91 = arith.constant dense<0.000000e+00> : vector<1xf32>
    %365 = vector.multi_reduction <add>, %364, %cst_91 [1] : vector<1x40xf32> to vector<1xf32>
    %366 = vector.shape_cast %365 : vector<1xf32> to vector<1x1xf32>
    %367 = math.log %366 : vector<1x1xf32>
    %368 = arith.addf %367, %361 : vector<1x1xf32>
    %369 = vector.broadcast %368 : vector<1x1xf32> to vector<1x40xf32>
    %370 = arith.subf %359, %369 : vector<1x40xf32>
    %cst_92 = arith.constant 0.000000e+00 : f32
    %371 = vector.broadcast %cst_92 : f32 to vector<1x24xf32>
    %cst_93 = arith.constant 0.000000e+00 : f32
    %372 = vector.broadcast %cst_93 : f32 to vector<1x16xf32>
    %373 = tpu.concatenate %370, %371, %355, %321, %372 in 1 : vector<1x40xf32>, vector<1x24xf32>, vector<1x32xf32>, vector<1x16xf32>, vector<1x16xf32> -> vector<1x128xf32>
    %374 = arith.index_cast %c4_i32 : i32 to index
    %c0_94 = arith.constant 0 : index
    %375 = vector.load %arg8[%374, %c0_94] : memref<8x128xf32, #tpu.memory_space<vmem>>, vector<1x128xf32>
    tpu.vector_store %arg8[%374, %c0_94], %373 {strides = array<i32>} : memref<8x128xf32, #tpu.memory_space<vmem>>, vector<1x128xf32>,
    %c5_i32 = arith.constant 5 : i32
    %376 = arith.index_cast %c5_i32 : i32 to index
    %377 = memref.load %arg1[%376] : memref<8xi32, #tpu.memory_space<smem>>
    %378 = arith.index_cast %377 : i32 to index
    %c0_95 = arith.constant 0 : index
    %379 = vector.load %arg2[%378, %c0_95] : memref<40x128xf32, #tpu.memory_space<vmem>>, vector<1x128xf32>
    %380 = arith.truncf %355 : vector<1x32xf32> to vector<1x32xbf16>
    %cst_96 = arith.constant dense<0.000000e+00> : vector<1x128xf32>
    %381 = tpu.matmul %380, %1, %cst_96 {dimension_numbers = #tpu.dot_dimension_numbers<[1], [0], [0], [1], [0, 0, 1, 1], [], []>} : vector<1x32xbf16>, vector<32x128xbf16>, vector<1x128xf32> -> vector<1x128xf32>
    %382 = vector.extract_strided_slice %379 {offsets = [0, 0], sizes = [1, 16], strides = [1, 1]} : vector<1x128xf32> to vector<1x16xf32>
    %383 = vector.extract_strided_slice %381 {offsets = [0, 0], sizes = [1, 16], strides = [1, 1]} : vector<1x128xf32> to vector<1x16xf32>
    %384 = arith.addf %382, %383 : vector<1x16xf32>
    %cst_97 = arith.constant dense<0xFF800000> : vector<1xf32>
    %385 = vector.multi_reduction <maximumf>, %384, %cst_97 [1] : vector<1x16xf32> to vector<1xf32>
    %386 = vector.shape_cast %385 : vector<1xf32> to vector<1x1xf32>
    %387 = vector.broadcast %386 : vector<1x1xf32> to vector<1x16xf32>
    %388 = arith.subf %384, %387 : vector<1x16xf32>
    %389 = math.exp %388 : vector<1x16xf32>
    %cst_98 = arith.constant dense<0.000000e+00> : vector<1xf32>
    %390 = vector.multi_reduction <add>, %389, %cst_98 [1] : vector<1x16xf32> to vector<1xf32>
    %391 = vector.shape_cast %390 : vector<1xf32> to vector<1x1xf32>
    %392 = tpu.reciprocal %391 {approx = true} : vector<1x1xf32> -> vector<1x1xf32>
    %393 = vector.broadcast %392 : vector<1x1xf32> to vector<1x16xf32>
    %394 = arith.mulf %389, %393 : vector<1x16xf32>
    %395 = arith.truncf %394 : vector<1x16xf32> to vector<1x16xbf16>
    %cst_99 = arith.constant dense<0.000000e+00> : vector<1x128xf32>
    %396 = tpu.matmul %395, %5, %cst_99 {dimension_numbers = #tpu.dot_dimension_numbers<[1], [0], [0], [1], [0, 0, 1, 1], [], []>} : vector<1x16xbf16>, vector<16x128xbf16>, vector<1x128xf32> -> vector<1x128xf32>
    %397 = vector.extract_strided_slice %379 {offsets = [0, 16], sizes = [1, 32], strides = [1, 1]} : vector<1x128xf32> to vector<1x32xf32>
    %398 = vector.extract_strided_slice %396 {offsets = [0, 0], sizes = [1, 32], strides = [1, 1]} : vector<1x128xf32> to vector<1x32xf32>
    %399 = arith.addf %397, %398 : vector<1x32xf32>
    %cst_100 = arith.constant 0.000000e+00 : f32
    %400 = vector.broadcast %cst_100 : f32 to vector<1x32xf32>
    %401 = arith.maximumf %399, %400 : vector<1x32xf32>
    %402 = tpu.concatenate %401, %355 in 1 : vector<1x32xf32>, vector<1x32xf32> -> vector<1x64xf32>
    %403 = arith.truncf %402 : vector<1x64xf32> to vector<1x64xbf16>
    %cst_101 = arith.constant dense<0.000000e+00> : vector<1x128xf32>
    %404 = tpu.matmul %403, %4, %cst_101 {dimension_numbers = #tpu.dot_dimension_numbers<[1], [0], [0], [1], [0, 0, 1, 1], [], []>} : vector<1x64xbf16>, vector<64x128xbf16>, vector<1x128xf32> -> vector<1x128xf32>
    %405 = arith.addf %404, %7 : vector<1x128xf32>
    %406 = vector.extract_strided_slice %405 {offsets = [0, 0], sizes = [1, 32], strides = [1, 1]} : vector<1x128xf32> to vector<1x32xf32>
    %407 = arith.negf %406 : vector<1x32xf32>
    %408 = math.exp %407 : vector<1x32xf32>
    %cst_102 = arith.constant 1.000000e+00 : f32
    %409 = vector.broadcast %cst_102 : f32 to vector<1x32xf32>
    %410 = arith.addf %409, %408 : vector<1x32xf32>
    %411 = arith.divf %409, %410 : vector<1x32xf32>
    %412 = vector.extract_strided_slice %405 {offsets = [0, 32], sizes = [1, 32], strides = [1, 1]} : vector<1x128xf32> to vector<1x32xf32>
    %413 = arith.negf %412 : vector<1x32xf32>
    %414 = math.exp %413 : vector<1x32xf32>
    %cst_103 = arith.constant 1.000000e+00 : f32
    %415 = vector.broadcast %cst_103 : f32 to vector<1x32xf32>
    %416 = arith.addf %415, %414 : vector<1x32xf32>
    %417 = arith.divf %415, %416 : vector<1x32xf32>
    %418 = vector.extract_strided_slice %405 {offsets = [0, 96], sizes = [1, 32], strides = [1, 1]} : vector<1x128xf32> to vector<1x32xf32>
    %419 = vector.extract_strided_slice %405 {offsets = [0, 64], sizes = [1, 32], strides = [1, 1]} : vector<1x128xf32> to vector<1x32xf32>
    %420 = arith.subf %419, %418 : vector<1x32xf32>
    %421 = arith.mulf %411, %418 : vector<1x32xf32>
    %422 = arith.addf %420, %421 : vector<1x32xf32>
    %423 = math.tanh %422 : vector<1x32xf32>
    %cst_104 = arith.constant 1.000000e+00 : f32
    %424 = vector.broadcast %cst_104 : f32 to vector<1x32xf32>
    %425 = arith.subf %424, %417 : vector<1x32xf32>
    %426 = arith.mulf %425, %423 : vector<1x32xf32>
    %427 = arith.mulf %417, %355 : vector<1x32xf32>
    %428 = arith.addf %426, %427 : vector<1x32xf32>
    %429 = arith.truncf %428 : vector<1x32xf32> to vector<1x32xbf16>
    %cst_105 = arith.constant dense<0.000000e+00> : vector<1x128xf32>
    %430 = tpu.matmul %429, %3, %cst_105 {dimension_numbers = #tpu.dot_dimension_numbers<[1], [0], [0], [1], [0, 0, 1, 1], [], []>} : vector<1x32xbf16>, vector<32x128xbf16>, vector<1x128xf32> -> vector<1x128xf32>
    %431 = arith.addf %430, %9 : vector<1x128xf32>
    %432 = vector.extract_strided_slice %431 {offsets = [0, 0], sizes = [1, 40], strides = [1, 1]} : vector<1x128xf32> to vector<1x40xf32>
    %cst_106 = arith.constant dense<0xFF800000> : vector<1xf32>
    %433 = vector.multi_reduction <maximumf>, %432, %cst_106 [1] : vector<1x40xf32> to vector<1xf32>
    %434 = vector.shape_cast %433 : vector<1xf32> to vector<1x1xf32>
    %435 = vector.broadcast %434 : vector<1x1xf32> to vector<1x40xf32>
    %436 = arith.subf %432, %435 : vector<1x40xf32>
    %437 = math.exp %436 : vector<1x40xf32>
    %cst_107 = arith.constant dense<0.000000e+00> : vector<1xf32>
    %438 = vector.multi_reduction <add>, %437, %cst_107 [1] : vector<1x40xf32> to vector<1xf32>
    %439 = vector.shape_cast %438 : vector<1xf32> to vector<1x1xf32>
    %440 = math.log %439 : vector<1x1xf32>
    %441 = arith.addf %440, %434 : vector<1x1xf32>
    %442 = vector.broadcast %441 : vector<1x1xf32> to vector<1x40xf32>
    %443 = arith.subf %432, %442 : vector<1x40xf32>
    %cst_108 = arith.constant 0.000000e+00 : f32
    %444 = vector.broadcast %cst_108 : f32 to vector<1x24xf32>
    %cst_109 = arith.constant 0.000000e+00 : f32
    %445 = vector.broadcast %cst_109 : f32 to vector<1x16xf32>
    %446 = tpu.concatenate %443, %444, %428, %394, %445 in 1 : vector<1x40xf32>, vector<1x24xf32>, vector<1x32xf32>, vector<1x16xf32>, vector<1x16xf32> -> vector<1x128xf32>
    %447 = arith.index_cast %c5_i32 : i32 to index
    %c0_110 = arith.constant 0 : index
    %448 = vector.load %arg8[%447, %c0_110] : memref<8x128xf32, #tpu.memory_space<vmem>>, vector<1x128xf32>
    tpu.vector_store %arg8[%447, %c0_110], %446 {strides = array<i32>} : memref<8x128xf32, #tpu.memory_space<vmem>>, vector<1x128xf32>,
    %c6_i32 = arith.constant 6 : i32
    %449 = arith.index_cast %c6_i32 : i32 to index
    %450 = memref.load %arg1[%449] : memref<8xi32, #tpu.memory_space<smem>>
    %451 = arith.index_cast %450 : i32 to index
    %c0_111 = arith.constant 0 : index
    %452 = vector.load %arg2[%451, %c0_111] : memref<40x128xf32, #tpu.memory_space<vmem>>, vector<1x128xf32>
    %453 = arith.truncf %428 : vector<1x32xf32> to vector<1x32xbf16>
    %cst_112 = arith.constant dense<0.000000e+00> : vector<1x128xf32>
    %454 = tpu.matmul %453, %1, %cst_112 {dimension_numbers = #tpu.dot_dimension_numbers<[1], [0], [0], [1], [0, 0, 1, 1], [], []>} : vector<1x32xbf16>, vector<32x128xbf16>, vector<1x128xf32> -> vector<1x128xf32>
    %455 = vector.extract_strided_slice %452 {offsets = [0, 0], sizes = [1, 16], strides = [1, 1]} : vector<1x128xf32> to vector<1x16xf32>
    %456 = vector.extract_strided_slice %454 {offsets = [0, 0], sizes = [1, 16], strides = [1, 1]} : vector<1x128xf32> to vector<1x16xf32>
    %457 = arith.addf %455, %456 : vector<1x16xf32>
    %cst_113 = arith.constant dense<0xFF800000> : vector<1xf32>
    %458 = vector.multi_reduction <maximumf>, %457, %cst_113 [1] : vector<1x16xf32> to vector<1xf32>
    %459 = vector.shape_cast %458 : vector<1xf32> to vector<1x1xf32>
    %460 = vector.broadcast %459 : vector<1x1xf32> to vector<1x16xf32>
    %461 = arith.subf %457, %460 : vector<1x16xf32>
    %462 = math.exp %461 : vector<1x16xf32>
    %cst_114 = arith.constant dense<0.000000e+00> : vector<1xf32>
    %463 = vector.multi_reduction <add>, %462, %cst_114 [1] : vector<1x16xf32> to vector<1xf32>
    %464 = vector.shape_cast %463 : vector<1xf32> to vector<1x1xf32>
    %465 = tpu.reciprocal %464 {approx = true} : vector<1x1xf32> -> vector<1x1xf32>
    %466 = vector.broadcast %465 : vector<1x1xf32> to vector<1x16xf32>
    %467 = arith.mulf %462, %466 : vector<1x16xf32>
    %468 = arith.truncf %467 : vector<1x16xf32> to vector<1x16xbf16>
    %cst_115 = arith.constant dense<0.000000e+00> : vector<1x128xf32>
    %469 = tpu.matmul %468, %5, %cst_115 {dimension_numbers = #tpu.dot_dimension_numbers<[1], [0], [0], [1], [0, 0, 1, 1], [], []>} : vector<1x16xbf16>, vector<16x128xbf16>, vector<1x128xf32> -> vector<1x128xf32>
    %470 = vector.extract_strided_slice %452 {offsets = [0, 16], sizes = [1, 32], strides = [1, 1]} : vector<1x128xf32> to vector<1x32xf32>
    %471 = vector.extract_strided_slice %469 {offsets = [0, 0], sizes = [1, 32], strides = [1, 1]} : vector<1x128xf32> to vector<1x32xf32>
    %472 = arith.addf %470, %471 : vector<1x32xf32>
    %cst_116 = arith.constant 0.000000e+00 : f32
    %473 = vector.broadcast %cst_116 : f32 to vector<1x32xf32>
    %474 = arith.maximumf %472, %473 : vector<1x32xf32>
    %475 = tpu.concatenate %474, %428 in 1 : vector<1x32xf32>, vector<1x32xf32> -> vector<1x64xf32>
    %476 = arith.truncf %475 : vector<1x64xf32> to vector<1x64xbf16>
    %cst_117 = arith.constant dense<0.000000e+00> : vector<1x128xf32>
    %477 = tpu.matmul %476, %4, %cst_117 {dimension_numbers = #tpu.dot_dimension_numbers<[1], [0], [0], [1], [0, 0, 1, 1], [], []>} : vector<1x64xbf16>, vector<64x128xbf16>, vector<1x128xf32> -> vector<1x128xf32>
    %478 = arith.addf %477, %7 : vector<1x128xf32>
    %479 = vector.extract_strided_slice %478 {offsets = [0, 0], sizes = [1, 32], strides = [1, 1]} : vector<1x128xf32> to vector<1x32xf32>
    %480 = arith.negf %479 : vector<1x32xf32>
    %481 = math.exp %480 : vector<1x32xf32>
    %cst_118 = arith.constant 1.000000e+00 : f32
    %482 = vector.broadcast %cst_118 : f32 to vector<1x32xf32>
    %483 = arith.addf %482, %481 : vector<1x32xf32>
    %484 = arith.divf %482, %483 : vector<1x32xf32>
    %485 = vector.extract_strided_slice %478 {offsets = [0, 32], sizes = [1, 32], strides = [1, 1]} : vector<1x128xf32> to vector<1x32xf32>
    %486 = arith.negf %485 : vector<1x32xf32>
    %487 = math.exp %486 : vector<1x32xf32>
    %cst_119 = arith.constant 1.000000e+00 : f32
    %488 = vector.broadcast %cst_119 : f32 to vector<1x32xf32>
    %489 = arith.addf %488, %487 : vector<1x32xf32>
    %490 = arith.divf %488, %489 : vector<1x32xf32>
    %491 = vector.extract_strided_slice %478 {offsets = [0, 96], sizes = [1, 32], strides = [1, 1]} : vector<1x128xf32> to vector<1x32xf32>
    %492 = vector.extract_strided_slice %478 {offsets = [0, 64], sizes = [1, 32], strides = [1, 1]} : vector<1x128xf32> to vector<1x32xf32>
    %493 = arith.subf %492, %491 : vector<1x32xf32>
    %494 = arith.mulf %484, %491 : vector<1x32xf32>
    %495 = arith.addf %493, %494 : vector<1x32xf32>
    %496 = math.tanh %495 : vector<1x32xf32>
    %cst_120 = arith.constant 1.000000e+00 : f32
    %497 = vector.broadcast %cst_120 : f32 to vector<1x32xf32>
    %498 = arith.subf %497, %490 : vector<1x32xf32>
    %499 = arith.mulf %498, %496 : vector<1x32xf32>
    %500 = arith.mulf %490, %428 : vector<1x32xf32>
    %501 = arith.addf %499, %500 : vector<1x32xf32>
    %502 = arith.truncf %501 : vector<1x32xf32> to vector<1x32xbf16>
    %cst_121 = arith.constant dense<0.000000e+00> : vector<1x128xf32>
    %503 = tpu.matmul %502, %3, %cst_121 {dimension_numbers = #tpu.dot_dimension_numbers<[1], [0], [0], [1], [0, 0, 1, 1], [], []>} : vector<1x32xbf16>, vector<32x128xbf16>, vector<1x128xf32> -> vector<1x128xf32>
    %504 = arith.addf %503, %9 : vector<1x128xf32>
    %505 = vector.extract_strided_slice %504 {offsets = [0, 0], sizes = [1, 40], strides = [1, 1]} : vector<1x128xf32> to vector<1x40xf32>
    %cst_122 = arith.constant dense<0xFF800000> : vector<1xf32>
    %506 = vector.multi_reduction <maximumf>, %505, %cst_122 [1] : vector<1x40xf32> to vector<1xf32>
    %507 = vector.shape_cast %506 : vector<1xf32> to vector<1x1xf32>
    %508 = vector.broadcast %507 : vector<1x1xf32> to vector<1x40xf32>
    %509 = arith.subf %505, %508 : vector<1x40xf32>
    %510 = math.exp %509 : vector<1x40xf32>
    %cst_123 = arith.constant dense<0.000000e+00> : vector<1xf32>
    %511 = vector.multi_reduction <add>, %510, %cst_123 [1] : vector<1x40xf32> to vector<1xf32>
    %512 = vector.shape_cast %511 : vector<1xf32> to vector<1x1xf32>
    %513 = math.log %512 : vector<1x1xf32>
    %514 = arith.addf %513, %507 : vector<1x1xf32>
    %515 = vector.broadcast %514 : vector<1x1xf32> to vector<1x40xf32>
    %516 = arith.subf %505, %515 : vector<1x40xf32>
    %cst_124 = arith.constant 0.000000e+00 : f32
    %517 = vector.broadcast %cst_124 : f32 to vector<1x24xf32>
    %cst_125 = arith.constant 0.000000e+00 : f32
    %518 = vector.broadcast %cst_125 : f32 to vector<1x16xf32>
    %519 = tpu.concatenate %516, %517, %501, %467, %518 in 1 : vector<1x40xf32>, vector<1x24xf32>, vector<1x32xf32>, vector<1x16xf32>, vector<1x16xf32> -> vector<1x128xf32>
    %520 = arith.index_cast %c6_i32 : i32 to index
    %c0_126 = arith.constant 0 : index
    %521 = vector.load %arg8[%520, %c0_126] : memref<8x128xf32, #tpu.memory_space<vmem>>, vector<1x128xf32>
    tpu.vector_store %arg8[%520, %c0_126], %519 {strides = array<i32>} : memref<8x128xf32, #tpu.memory_space<vmem>>, vector<1x128xf32>,
    %c7_i32 = arith.constant 7 : i32
    %522 = arith.index_cast %c7_i32 : i32 to index
    %523 = memref.load %arg1[%522] : memref<8xi32, #tpu.memory_space<smem>>
    %524 = arith.index_cast %523 : i32 to index
    %c0_127 = arith.constant 0 : index
    %525 = vector.load %arg2[%524, %c0_127] : memref<40x128xf32, #tpu.memory_space<vmem>>, vector<1x128xf32>
    %526 = arith.truncf %501 : vector<1x32xf32> to vector<1x32xbf16>
    %cst_128 = arith.constant dense<0.000000e+00> : vector<1x128xf32>
    %527 = tpu.matmul %526, %1, %cst_128 {dimension_numbers = #tpu.dot_dimension_numbers<[1], [0], [0], [1], [0, 0, 1, 1], [], []>} : vector<1x32xbf16>, vector<32x128xbf16>, vector<1x128xf32> -> vector<1x128xf32>
    %528 = vector.extract_strided_slice %525 {offsets = [0, 0], sizes = [1, 16], strides = [1, 1]} : vector<1x128xf32> to vector<1x16xf32>
    %529 = vector.extract_strided_slice %527 {offsets = [0, 0], sizes = [1, 16], strides = [1, 1]} : vector<1x128xf32> to vector<1x16xf32>
    %530 = arith.addf %528, %529 : vector<1x16xf32>
    %cst_129 = arith.constant dense<0xFF800000> : vector<1xf32>
    %531 = vector.multi_reduction <maximumf>, %530, %cst_129 [1] : vector<1x16xf32> to vector<1xf32>
    %532 = vector.shape_cast %531 : vector<1xf32> to vector<1x1xf32>
    %533 = vector.broadcast %532 : vector<1x1xf32> to vector<1x16xf32>
    %534 = arith.subf %530, %533 : vector<1x16xf32>
    %535 = math.exp %534 : vector<1x16xf32>
    %cst_130 = arith.constant dense<0.000000e+00> : vector<1xf32>
    %536 = vector.multi_reduction <add>, %535, %cst_130 [1] : vector<1x16xf32> to vector<1xf32>
    %537 = vector.shape_cast %536 : vector<1xf32> to vector<1x1xf32>
    %538 = tpu.reciprocal %537 {approx = true} : vector<1x1xf32> -> vector<1x1xf32>
    %539 = vector.broadcast %538 : vector<1x1xf32> to vector<1x16xf32>
    %540 = arith.mulf %535, %539 : vector<1x16xf32>
    %541 = arith.truncf %540 : vector<1x16xf32> to vector<1x16xbf16>
    %cst_131 = arith.constant dense<0.000000e+00> : vector<1x128xf32>
    %542 = tpu.matmul %541, %5, %cst_131 {dimension_numbers = #tpu.dot_dimension_numbers<[1], [0], [0], [1], [0, 0, 1, 1], [], []>} : vector<1x16xbf16>, vector<16x128xbf16>, vector<1x128xf32> -> vector<1x128xf32>
    %543 = vector.extract_strided_slice %525 {offsets = [0, 16], sizes = [1, 32], strides = [1, 1]} : vector<1x128xf32> to vector<1x32xf32>
    %544 = vector.extract_strided_slice %542 {offsets = [0, 0], sizes = [1, 32], strides = [1, 1]} : vector<1x128xf32> to vector<1x32xf32>
    %545 = arith.addf %543, %544 : vector<1x32xf32>
    %cst_132 = arith.constant 0.000000e+00 : f32
    %546 = vector.broadcast %cst_132 : f32 to vector<1x32xf32>
    %547 = arith.maximumf %545, %546 : vector<1x32xf32>
    %548 = tpu.concatenate %547, %501 in 1 : vector<1x32xf32>, vector<1x32xf32> -> vector<1x64xf32>
    %549 = arith.truncf %548 : vector<1x64xf32> to vector<1x64xbf16>
    %cst_133 = arith.constant dense<0.000000e+00> : vector<1x128xf32>
    %550 = tpu.matmul %549, %4, %cst_133 {dimension_numbers = #tpu.dot_dimension_numbers<[1], [0], [0], [1], [0, 0, 1, 1], [], []>} : vector<1x64xbf16>, vector<64x128xbf16>, vector<1x128xf32> -> vector<1x128xf32>
    %551 = arith.addf %550, %7 : vector<1x128xf32>
    %552 = vector.extract_strided_slice %551 {offsets = [0, 0], sizes = [1, 32], strides = [1, 1]} : vector<1x128xf32> to vector<1x32xf32>
    %553 = arith.negf %552 : vector<1x32xf32>
    %554 = math.exp %553 : vector<1x32xf32>
    %cst_134 = arith.constant 1.000000e+00 : f32
    %555 = vector.broadcast %cst_134 : f32 to vector<1x32xf32>
    %556 = arith.addf %555, %554 : vector<1x32xf32>
    %557 = arith.divf %555, %556 : vector<1x32xf32>
    %558 = vector.extract_strided_slice %551 {offsets = [0, 32], sizes = [1, 32], strides = [1, 1]} : vector<1x128xf32> to vector<1x32xf32>
    %559 = arith.negf %558 : vector<1x32xf32>
    %560 = math.exp %559 : vector<1x32xf32>
    %cst_135 = arith.constant 1.000000e+00 : f32
    %561 = vector.broadcast %cst_135 : f32 to vector<1x32xf32>
    %562 = arith.addf %561, %560 : vector<1x32xf32>
    %563 = arith.divf %561, %562 : vector<1x32xf32>
    %564 = vector.extract_strided_slice %551 {offsets = [0, 96], sizes = [1, 32], strides = [1, 1]} : vector<1x128xf32> to vector<1x32xf32>
    %565 = vector.extract_strided_slice %551 {offsets = [0, 64], sizes = [1, 32], strides = [1, 1]} : vector<1x128xf32> to vector<1x32xf32>
    %566 = arith.subf %565, %564 : vector<1x32xf32>
    %567 = arith.mulf %557, %564 : vector<1x32xf32>
    %568 = arith.addf %566, %567 : vector<1x32xf32>
    %569 = math.tanh %568 : vector<1x32xf32>
    %cst_136 = arith.constant 1.000000e+00 : f32
    %570 = vector.broadcast %cst_136 : f32 to vector<1x32xf32>
    %571 = arith.subf %570, %563 : vector<1x32xf32>
    %572 = arith.mulf %571, %569 : vector<1x32xf32>
    %573 = arith.mulf %563, %501 : vector<1x32xf32>
    %574 = arith.addf %572, %573 : vector<1x32xf32>
    %575 = arith.truncf %574 : vector<1x32xf32> to vector<1x32xbf16>
    %cst_137 = arith.constant dense<0.000000e+00> : vector<1x128xf32>
    %576 = tpu.matmul %575, %3, %cst_137 {dimension_numbers = #tpu.dot_dimension_numbers<[1], [0], [0], [1], [0, 0, 1, 1], [], []>} : vector<1x32xbf16>, vector<32x128xbf16>, vector<1x128xf32> -> vector<1x128xf32>
    %577 = arith.addf %576, %9 : vector<1x128xf32>
    %578 = vector.extract_strided_slice %577 {offsets = [0, 0], sizes = [1, 40], strides = [1, 1]} : vector<1x128xf32> to vector<1x40xf32>
    %cst_138 = arith.constant dense<0xFF800000> : vector<1xf32>
    %579 = vector.multi_reduction <maximumf>, %578, %cst_138 [1] : vector<1x40xf32> to vector<1xf32>
    %580 = vector.shape_cast %579 : vector<1xf32> to vector<1x1xf32>
    %581 = vector.broadcast %580 : vector<1x1xf32> to vector<1x40xf32>
    %582 = arith.subf %578, %581 : vector<1x40xf32>
    %583 = math.exp %582 : vector<1x40xf32>
    %cst_139 = arith.constant dense<0.000000e+00> : vector<1xf32>
    %584 = vector.multi_reduction <add>, %583, %cst_139 [1] : vector<1x40xf32> to vector<1xf32>
    %585 = vector.shape_cast %584 : vector<1xf32> to vector<1x1xf32>
    %586 = math.log %585 : vector<1x1xf32>
    %587 = arith.addf %586, %580 : vector<1x1xf32>
    %588 = vector.broadcast %587 : vector<1x1xf32> to vector<1x40xf32>
    %589 = arith.subf %578, %588 : vector<1x40xf32>
    %cst_140 = arith.constant 0.000000e+00 : f32
    %590 = vector.broadcast %cst_140 : f32 to vector<1x24xf32>
    %cst_141 = arith.constant 0.000000e+00 : f32
    %591 = vector.broadcast %cst_141 : f32 to vector<1x16xf32>
    %592 = tpu.concatenate %589, %590, %574, %540, %591 in 1 : vector<1x40xf32>, vector<1x24xf32>, vector<1x32xf32>, vector<1x16xf32>, vector<1x16xf32> -> vector<1x128xf32>
    %593 = arith.index_cast %c7_i32 : i32 to index
    %c0_142 = arith.constant 0 : index
    %594 = vector.load %arg8[%593, %c0_142] : memref<8x128xf32, #tpu.memory_space<vmem>>, vector<1x128xf32>
    tpu.vector_store %arg8[%593, %c0_142], %592 {strides = array<i32>} : memref<8x128xf32, #tpu.memory_space<vmem>>, vector<1x128xf32>,
    %c8_i32 = arith.constant 8 : i32
    return
  }
  func.func @transform_0(%arg0: i32, %arg1: memref<8xi32, #tpu.memory_space<smem>>) -> (i32, i32) {
    %c0_i32 = arith.constant 0 : i32
    %c0_i32_0 = arith.constant 0 : i32
    %c0_i32_1 = arith.constant 0 : i32
    return %c0_i32, %c0_i32_0 : i32, i32
  }
  func.func @transform_1(%arg0: i32, %arg1: memref<8xi32, #tpu.memory_space<smem>>) -> (i32, i32, i32) {
    %c0_i32 = arith.constant 0 : i32
    %c0_i32_0 = arith.constant 0 : i32
    %c0_i32_1 = arith.constant 0 : i32
    %c0_i32_2 = arith.constant 0 : i32
    return %c0_i32, %c0_i32_0, %c0_i32_1 : i32, i32, i32
  }
  func.func @transform_2(%arg0: i32, %arg1: memref<8xi32, #tpu.memory_space<smem>>) -> (i32, i32) {
    %c0_i32 = arith.constant 0 : i32
    %c0_i32_0 = arith.constant 0 : i32
    %c0_i32_1 = arith.constant 0 : i32
    return %c0_i32, %c0_i32_0 : i32, i32
  }
  func.func @transform_3(%arg0: i32, %arg1: memref<8xi32, #tpu.memory_space<smem>>) -> (i32, i32) {
    %c0_i32 = arith.constant 0 : i32
    %c0_i32_0 = arith.constant 0 : i32
    %c0_i32_1 = arith.constant 0 : i32
    return %c0_i32, %c0_i32_0 : i32, i32
  }
  func.func @transform_4(%arg0: i32, %arg1: memref<8xi32, #tpu.memory_space<smem>>) -> (i32, i32, i32) {
    %c0_i32 = arith.constant 0 : i32
    %c0_i32_0 = arith.constant 0 : i32
    %c0_i32_1 = arith.constant 0 : i32
    %c0_i32_2 = arith.constant 0 : i32
    return %c0_i32, %c0_i32_0, %c0_i32_1 : i32, i32, i32
  }
  func.func @transform_5(%arg0: i32, %arg1: memref<8xi32, #tpu.memory_space<smem>>) -> (i32, i32) {
    %c0_i32 = arith.constant 0 : i32
    %c0_i32_0 = arith.constant 0 : i32
    %c0_i32_1 = arith.constant 0 : i32
    return %c0_i32, %c0_i32_0 : i32, i32
  }
  func.func @transform_6(%arg0: i32, %arg1: memref<8xi32, #tpu.memory_space<smem>>) -> (i32, i32) {
    %c0_i32 = arith.constant 0 : i32
    %c0_i32_0 = arith.constant 0 : i32
    %c0_i32_1 = arith.constant 0 : i32
    return %c0_i32, %c0_i32_0 : i32, i32
  }
}

</mosaic_0001>

<bundles_post_ra>
// kernel: attn_decoder_decode.1
= control target key start
LH: loop header
LB: loop body
LE: loop exit
PB: predicated region body
PF: predicated region fallthrough
CT: control target
= control target key end

     0   :  { %s3598_s0 = inlined_call_operand.vmem [shape: s32[8], index: 0, kind: input, shape index: {}]   ;;  %s3599_s1 = inlined_call_operand.vmem [shape: f32[40,128], index: 1, kind: input, shape index: {}]   ;;  %s3600_s2 = inlined_call_operand.vmem [shape: bf16[2,32,128], index: 2, kind: input, shape index: {}]   ;;  %s3601_s3 = inlined_call_operand.hbm [shape: bf16[64,128], index: 3, kind: input, shape index: {}]   ;;  %s3602_s4 = inlined_call_operand.vmem [shape: bf16[16,128], index: 4, kind: input, shape index: {}]   ;;  %s3603_s5 = inlined_call_operand.vmem [shape: f32[2,1,128], index: 5, kind: input, shape index: {}]   ;;  %s3604_s6 = inlined_call_operand.vmem [shape: f32[1,32], index: 6, kind: input, shape index: {}]   ;;  %s3605_s7 = inlined_call_operand.vmem [shape: f32[8,128], index: 7, kind: output, shape index: {}]  }
   0x1   :  { %s12_s26 = sshll.u32 %s3598_s0, 4  ;;  %s13_s26 = int_to_ptr.vmem [resolvable:$true] %s12_s26 }
   0x2   :  { %s2781_s27 = scalar_lea.vmem %s13_s26, 16  ;;  %p2786_p1 = scmp.lt.s32.totalorder %s13_s26, %s13_s26 }
   0x3   :  { %p2782_p0 = scmp.ne.s32.totalorder %s13_s26, %s2781_s27  ;;  %p2787_p2 = scmp.lt.s32.totalorder %s2781_s27, %s2781_s27 }
   0x5   :  { %p2788_p3 = por %p2787_p2, %p2786_p1 }
   0x7   :  { %p2789_p4 = pnand %p2788_p3, %p2782_p0 }
   0x9   :  { %2792 = shalt.err (!%p2789_p4)  }
   0xa   :  { %s2819_s28 = smov [#allocation3]  }
   0xb   :  { %15 = dma.vmem_to_smem %s13_s26, 16, %s2819_s28, [#allocation2] }
   0xc   :  { %2815 = dma.done.wait [#allocation2], 16 }
   0xd   :  { %2816 = vsyncadd [#allocation2], 4294967280 }
   0xe   :  { %17 = sfence }
   0xf   :  { %18 = vsyncpa [#allocation5], 0  ;;  %s2820_s29 = smov [#allocation4]   ;;  %s2793_s0 = scalar_lea.hbm %s3601_s3, 512 }
  0x10   :  { %s28_s30 = sshll.u32 %s2820_s29, 4  ;;  %p2794_p5 = scmp.ne.s32.totalorder %s3601_s3, %s2793_s0  ;;  %s29_s30 = int_to_ptr.vmem [resolvable:$true] %s28_s30 }
  0x11   :  { %p2797_p6 = scmp.lt.u32.totalorder %s2793_s0, %s3601_s3 }
  0x13   :  { %p2799_p7 = pnand %p2797_p6, %p2794_p5 }
  0x15   :  { %2802 = shalt.err (!%p2799_p7)
}
  0x16   :  { %s2803_s14 = scalar_lea.vmem %s29_s30, 512  ;;  %p2808_p9 = scmp.lt.s32.totalorder %s29_s30, %s29_s30 }
  0x17   :  { %p2804_p8 = scmp.ne.s32.totalorder %s29_s30, %s2803_s14  ;;  %p2809_p10 = scmp.lt.s32.totalorder %s2803_s14, %s2803_s14 }
  0x19   :  { %p2810_p11 = por %p2809_p10, %p2808_p9 }
  0x1b   :  { %p2811_p12 = pnand %p2810_p11, %p2804_p8 }
  0x1d   :  { %2814 = shalt.err (!%p2811_p12)
}
  0x1e   :  { %s2821_s15 = smov 64   ;;  %s2822_s16 = smov 4  }
  0x1f   :  { %34 = dma.hbm_to_vmem [thread:$0]  %s3601_s3, 512, %s29_s30, [#allocation5], %s2821_s15, %s2821_s15, %s2822_s16  }
  0x20   :  { %2817 = dma.done.wait [#allocation5], 512  }
  0x21   :  { %2818 = vsyncadd [#allocation5], 4294966784  ;;  %v2823_v0 = vmov 0.0   ;;  %vm2824_vm0 = vmmov 0   ;;  %v2895_v1 = vld [vmem:[%s3600_s2] sm:$0xff]   ;;  %v2901_v2 = vld [vmem:[%s3600_s2 + $0x8] sm:$0xff]   ;;  %v203_v22 = vlaneseq }
  0x22   :  { %2368 = vmatprep.subr.bf16.mxu0 %v2823_v0  ;;  %2372 = vmatprep.mubr.msk.bf16.mxu0 %vm2824_vm0, %v2823_v0  ;;  %v67_v3 = vld [vmem:[%s3604_s6] sm:$0x1]  ;;  %vm84_vm1 = vcmask 261120   ;;  %s68_s24 = sld [smem:[#allocation3]]  ;;  %vm129_vm2 = vcmask 122880   ;;  %vm148_vm3 = vcmask 130048  }
  0x23   :  { %2376 = vmatprep.subr.bf16.mxu1 %v2823_v0  ;;  %2378 = vmatprep.mubr.msk.bf16.mxu1 %vm2824_vm0, %v2823_v0  ;;  %v71_v4 = vpack.c.bf16 %v67_v3, %v67_v3  ;;  %v2920_v17 = vld [vmem:[%s3602_s4] sm:$0xff]   ;;  %v204_v23 = vshrl.u32 %v203_v22, 7  ;;  %s2825_s29 = smov 32   ;;  %v2935_v27 = vld [vmem:[#allocation4 + $0x8] sm:$0xff]   ;;  %v2939_v28 = vld [vmem:[#allocation4 + $0x10] sm:$0xff]   ;;  %s2826_s30 = smov 16  }
  0x24   :  { %2369 = vmatpush3.bf16.msra.mxu0 %v2895_v1  ;;  %2377 = vmatpush3.bf16.msra.mxu1 %v2920_v17  ;;  %v2932_v26 = vld [vmem:[#allocation4] sm:$0xff]   ;;  %v2945_v33 = vld [vmem:[#allocation4 + $0x18] sm:$0xff]   ;;  %s2827_s8 = smov 112   ;;  %vm236_vm4 = vcmask 523264   ;;  %s2828_s10 = smov 96   ;;  %v2968_v57 = vld [vmem:[%s3600_s2 + $0x10] sm:$0xff]  }
  0x25   :  { %2370 = vmatprep.subr.bf16.mxu0 %v2823_v0  ;;  %2382 = vmatprep.subr.bf16.mxu1 %v2823_v0  ;;  %v205_v24 = vsub.s32 0, %v204_v23  ;;  %v2959_v41 = vld [vmem:[%s3603_s5] sm:$0x1]  ;;  %v2974_v58 = vld [vmem:[%s3600_s2 + $0x18] sm:$0xff]   ;;  %s2222_s16 = sld [smem:[#allocation3 + $0x1]]  ;;  %s2228_s20 = sld [smem:[#allocation3 + $0x2]] }
  0x26   :  { %s2234_s23 = sld [smem:[#allocation3 + $0x3]]  ;;  %s2246_s14 = sld [smem:[#allocation3 + $0x5]]  ;;  %vm368_vm5 = vcmask 319488   ;;  %vm390_vm6 = vcmask 326656   ;;  %vm393_vm7 = vcmask 785408   ;;  %vm395_vm8 = vcmask 916480  }
  0x27   :  { %v206_v25 = vrot.slane %v67_v3, %v205_v24  ;;  %s2258_s6 = sld [smem:[#allocation3 + $0x7]] }
  0x28   :  { %2371 = vmatpush3.bf16.msra.mxu0 %v2901_v2  ;;  %s69_s27 = scalar_lea.vmem %s3599_s1, %s68_s24 }
  0x29   :  { %2394 = vmatprep.subr.bf16.mxu0 %v2823_v0  ;;  %v70_v5 = vld [vmem:[%s69_s27] sm:$0x1]  ;;  %s2240_s27 = sld [smem:[#allocation3 + $0x4]] }
  0x2b   :  { %2373 = vmatmul.mubr.msk.bf16.vlgmr.msra.gmra.mrb[0].mxu0 %vm84_vm1, %v71_v4  ;;  %s399_s19 = scalar_lea.vmem %s3599_s1, %s2222_s16  ;;  %s655_s22 = scalar_lea.vmem %s3599_s1, %s2228_s20 }
  0x2c   :  { %2398 = vmatprep.mubr.msk.bf16.mxu0 %vm2824_vm0, %v2823_v0  ;;  %2395 = vmatpush3.bf16.msra.mxu0 %v2968_v57  ;;  %s911_s26 = scalar_lea.vmem %s3599_s1, %s2234_s23  ;;  %s1423_s18 = scalar_lea.vmem %s3599_s1, %s2246_s14 }
  0x2d   :  { %2396 = vmatprep.subr.bf16.mxu0 %v2823_v0  ;;  %s1935_s0 = scalar_lea.vmem %s3599_s1, %s2258_s6 }
  0x2f   :  { %s1167_s9 = scalar_lea.vmem %s3599_s1, %s2240_s27 }
  0x30   :  { %2397 = vmatpush3.bf16.msra.mxu0 %v2974_v58 }
  0x31   :  { %2402 = vmatprep.subr.bf16.mxu0 %v2823_v0 }
  0xfe   :  { %v122_v6 = vpop.f32.mrb[0].mxu0 }
  0xff   :  { %v128_v7 = vadd.f32 %v122_v6, %v70_v5  ;;  %v2374_v8 = vpop.f32.mrb[1].mxu0 }
 0x100   :  { %v125_v9 = vpop.f32.mrb[2].mxu0 }
 0x101   :  { %v2375_v10 = vpop.f32.mrb[3].mxu0  ;;  %v130_v11 = vsel %vm129_vm2, %v128_v7, -inf }
 0x102   :  { %131 = vmax.xlane.f32.xlu0 %v130_v11  ;;  %v400_v10 = vld [vmem:[%s399_s19] sm:$0x1] }
 0x18f   :  { %v132_v12 = vpop.xlane.xlu0 %131 }
 0x190   :  { %v133_v13 = vsub.f32 %v128_v7, %v132_v12 }
 0x192   :  { %v134_v14 = vmul.f32 1.442695, %v133_v13 }
 0x194   :  { %2659 = vpow2.f32 %v134_v14 }
 0x19e   :  { %v2660_v15 = vpop.eup %2659 }
 0x19f   :  { %v136_v16 = vsel %vm129_vm2, %v2660_v15, 0.0 }
 0x1a0   :  { %137 = vadd.xlane.f32.xlu0 %v136_v16 }
 0x1b6   :  { %207 = vrot.lane.b32.xlu0 %v206_v25, %s2825_s29 }
 0x22d   :  { %v138_v18 = vpop.xlane.xlu0 %137 }
 0x22e   :  { %2661 = vrcp.f32 %v138_v18 }
 0x231   :  { %v208_v37 = vpop.permute.xlu0 %207 }
 0x238   :  { %v2662_v19 = vpop.eup %2661 }
 0x239   :  { %v2924_v20 = vmul.f32 %v2662_v19, %v2660_v15 }
 0x23b   :  { %v141_v21 = vpack.c.bf16 %v2924_v20, %v2924_v20 }
 0x23d   :  { %2379 = vmatmul.mubr.msk.bf16.vlgmr.msra.gmra.mrb[0].mxu1 %vm148_vm3, %v141_v21 }
 0x23e   :  { %2390 = vmatprep.mubr.msk.bf16.mxu1 %vm2824_vm0, %v2823_v0  ;;  %2383 = vmatpush3.bf16.msra.mxu1 %v2932_v26 }
 0x23f   :  { %2384 = vmatprep.subr.bf16.mxu1 %v2823_v0 }
 0x242   :  { %2385 = vmatpush3.bf16.msra.mxu1 %v2935_v27 }
 0x243   :  { %2386 = vmatprep.subr.bf16.mxu1 %v2823_v0 }
 0x246   :  { %2387 = vmatpush3.bf16.msra.mxu1 %v2939_v28 }
 0x247   :  { %2388 = vmatprep.subr.bf16.mxu1 %v2823_v0 }
 0x24a   :  { %2389 = vmatpush3.bf16.msra.mxu1 %v2945_v33 }
 0x24b   :  { %2410 = vmatprep.subr.bf16.mxu1 %v2823_v0 }
 0x310   :  { %v186_v29 = vpop.f32.mrb[0].mxu1 }
 0x311   :  { %193 = vrot.lane.b32.xlu1 %v186_v29, %s2826_s30  ;;  %v2380_v30 = vpop.f32.mrb[1].mxu1 }
 0x312   :  { %v189_v31 = vpop.f32.mrb[2].mxu1 }
 0x313   :  { %v2381_v32 = vpop.f32.mrb[3].mxu1 }
 0x383   :  { %v194_v34 = vpop.permute.xlu1 %193 }
 0x384   :  { %v196_v35 = vadd.f32 %v194_v34, %v70_v5 }
 0x386   :  { %v197_v36 = vmax.f32 %v196_v35, 0.0 }
 0x388   :  { %199 = vrot.lane.b32.xlu1 %v197_v36, %s2827_s8 }
 0x3fa   :  { %v200_v38 = vpop.permute.xlu1 %199 }
 0x3fb   :  { %v210_v39 = vsel %vm84_vm1, %v200_v38, %v208_v37 }
 0x3fc   :  { %v211_v40 = vpack.c.bf16 %v210_v39, %v210_v39 }
 0x3fe   :  { %2391 = vmatmul.mubr.msk.bf16.vlgmr.msra.gmra.mrb[4].mxu1 %vm236_vm4, %v211_v40 }
 0x3ff   :  { %2411 = vmatpush3.bf16.msra.mxu1 %v2920_v17  ;;  %2412 = vmatprep.mubr.msk.bf16.mxu1 %vm2824_vm0, %v2823_v0 }
 0x400   :  { %2428 = vmatprep.subr.bf16.mxu1 %v2823_v0 }
 0x4d1   :  { %v274_v42 = vpop.f32.mrb[4].mxu1 }
 0x4d2   :  { %v275_v43 = vadd.f32 %v274_v42, %v2959_v41  ;;  %v2392_v44 = vpop.f32.mrb[5].mxu1 }
 0x4d3   :  { %v277_v45 = vpop.f32.mrb[6].mxu1 }
 0x4d4   :  { %291 = vrot.lane.b32.xlu1 %v275_v43, %s2825_s29  ;;  %v2393_v46 = vpop.f32.mrb[7].mxu1  ;;  %v2218_v47 = vmul.f32 -1.442695, %v275_v43 }
 0x4d6   :  { %2663 = vpow2.f32 %v2218_v47 }
 0x4d8   :  { %287 = vrot.lane.b32.xlu1 %v275_v43, %s2828_s10 }
 0x4e0   :  { %v2664_v48 = vpop.eup %2663 }
 0x4e1   :  { %v283_v49 = vadd.f32 1.0, %v2664_v48 }
 0x4e3   :  { %2665 = vrcp.f32 %v283_v49 }
 0x4ed   :  { %v2666_v50 = vpop.eup %2665 }
 0x4ee   :  { %v301_v60 = vsub.f32 1.0, %v2666_v50  ;;  %v307_v62 = vmul.f32 %v2666_v50, %v208_v37 }
 0x546   :  { %v292_v51 = vpop.permute.xlu1 %291 }
 0x547   :  { %v294_v52 = vmul.f32 %v2666_v50, %v292_v51 }
 0x549   :  { %296 = vrot.lane.b32.xlu1 %v294_v52, %s2821_s15 }
 0x54a   :  { %v288_v53 = vpop.permute.xlu1 %287 }
 0x54b   :  { %v290_v54 = vsub.f32 %v275_v43, %v288_v53 }
 0x5bb   :  { %v297_v55 = vpop.permute.xlu1 %296 }
 0x5bc   :  { %v299_v56 = vadd.f32 %v297_v55, %v290_v54 }
 0x5be   :  { %2667 = vtanh.f32 %v299_v56 }
 0x5c8   :  { %v2668_v59 = vpop.eup %2667 }
 0x5c9   :  { %303 = vrot.lane.b32.xlu1 %v2668_v59, %s2828_s10 }
 0x63b   :  { %v304_v61 = vpop.permute.xlu1 %303 }
 0x63c   :  { %v306_v63 = vmul.f32 %v304_v61, %v301_v60 }
 0x63e   :  { %v2980_v3 = vadd.f32 %v307_v62, %v306_v63 }
 0x640   :  { %v309_v4 = vpack.c.bf16 %v2980_v3, %v2980_v3 }
 0x642   :  { %311 = vrot.lane.b32.xlu1 %v309_v4, %s2828_s10 }
 0x6b4   :  { %v312_v5 = vpop.permute.xlu1 %311 }
 0x6b5   :  { %2399 = vmatmul.mubr.msk.bf16.vlgmr.msra.gmra.mrb[4].mxu0 %vm84_vm1, %v312_v5 }
 0x6b6   :  { %2403 = vmatpush3.bf16.msra.mxu0 %v2895_v1  ;;  %2406 = vmatprep.mubr.msk.bf16.mxu0 %vm2824_vm0, %v2823_v0 }
 0x6b7   :  { %2404 = vmatprep.subr.bf16.mxu0 %v2823_v0 }
 0x6ba   :  { %2405 = vmatpush3.bf16.msra.mxu0 %v2901_v2 }
 0x6bb   :  { %2416 = vmatprep.subr.bf16.mxu0 %v2823_v0 }
 0x6bd   :  { %2407 = vmatmul.mubr.msk.bf16.vlgmr.msra.gmra.mrb[8].mxu0 %vm84_vm1, %v312_v5 }
 0x6be   :  { %2417 = vmatpush3.bf16.msra.mxu0 %v2932_v26  ;;  %2424 = vmatprep.mubr.msk.bf16.mxu0 %vm2824_vm0, %v2823_v0 }
 0x6bf   :  { %2418 = vmatprep.subr.bf16.mxu0 %v2823_v0 }
 0x6c2   :  { %2419 = vmatpush3.bf16.msra.mxu0 %v2935_v27 }
 0x6c3   :  { %2420 = vmatprep.subr.bf16.mxu0 %v2823_v0 }
 0x6c6   :  { %2421 = vmatpush3.bf16.msra.mxu0 %v2939_v28 }
 0x6c7   :  { %2422 = vmatprep.subr.bf16.mxu0 %v2823_v0 }
 0x6ca   :  { %2423 = vmatpush3.bf16.msra.mxu0 %v2945_v33 }
 0x6cb   :  { %2444 = vmatprep.subr.bf16.mxu0 %v2823_v0 }
 0x788   :  { %v3003_v6 = vpop.f32.mrb[4].mxu0 }
 0x789   :  { %v2400_v7 = vpop.f32.mrb[5].mxu0 }
 0x78a   :  { %v365_v8 = vpop.f32.mrb[6].mxu0 }
 0x78b   :  { %v2401_v9 = vpop.f32.mrb[7].mxu0 }
 0x790   :  { %v435_v11 = vpop.f32.mrb[8].mxu0 }
 0x791   :  { %v441_v12 = vadd.f32 %v435_v11, %v400_v10  ;;  %v2408_v13 = vpop.f32.mrb[9].mxu0 }
 0x792   :  { %v438_v14 = vpop.f32.mrb[10].mxu0  ;;  %v656_v13 = vld [vmem:[%s655_s22] sm:$0x1] }
 0x793   :  { %v2409_v15 = vpop.f32.mrb[11].mxu0  ;;  %v442_v16 = vsel %vm129_vm2, %v441_v12, -inf }
 0x794   :  { %443 = vmax.xlane.f32.xlu1 %v442_v16 }
 0x821   :  { %v444_v18 = vpop.xlane.xlu1 %443 }
 0x822   :  { %v445_v19 = vsub.f32 %v441_v12, %v444_v18 }
 0x824   :  { %v446_v21 = vmul.f32 1.442695, %v445_v19 }
 0x826   :  { %2669 = vpow2.f32 %v446_v21 }
 0x830   :  { %v2670_v22 = vpop.eup %2669 }
 0x831   :  { %v448_v23 = vsel %vm129_vm2, %v2670_v22, 0.0 }
 0x832   :  { %449 = vadd.xlane.f32.xlu0 %v448_v23 }
 0x8bf   :  { %v450_v24 = vpop.xlane.xlu0 %449 }
 0x8c0   :  { %2671 = vrcp.f32 %v450_v24 }
 0x8ca   :  { %v2672_v25 = vpop.eup %2671 }
 0x8cb   :  { %v3010_v29 = vmul.f32 %v2672_v25, %v2670_v22 }
 0x8cd   :  { %v453_v30 = vpack.c.bf16 %v3010_v29, %v3010_v29 }
 0x8cf   :  { %2413 = vmatmul.mubr.msk.bf16.vlgmr.msra.gmra.mrb[8].mxu1 %vm148_vm3, %v453_v30 }
 0x8d0   :  { %2429 = vmatpush3.bf16.msra.mxu1 %v2968_v57  ;;  %2432 = vmatprep.mubr.msk.bf16.mxu1 %vm2824_vm0, %v2823_v0 }
 0x8d1   :  { %2430 = vmatprep.subr.bf16.mxu1 %v2823_v0 }
 0x8d4   :  { %2431 = vmatpush3.bf16.msra.mxu1 %v2974_v58 }
 0x8d5   :  { %2436 = vmatprep.subr.bf16.mxu1 %v2823_v0 }
 0x9a2   :  { %v491_v31 = vpop.f32.mrb[8].mxu1 }
 0x9a3   :  { %498 = vrot.lane.b32.xlu0 %v491_v31, %s2826_s30  ;;  %v2414_v32 = vpop.f32.mrb[9].mxu1 }
 0x9a4   :  { %v494_v34 = vpop.f32.mrb[10].mxu1 }
 0x9a5   :  { %v2415_v35 = vpop.f32.mrb[11].mxu1 }
 0xa15   :  { %v499_v36 = vpop.permute.xlu0 %498 }
 0xa16   :  { %v501_v37 = vadd.f32 %v499_v36, %v400_v10 }
 0xa18   :  { %v502_v38 = vmax.f32 %v501_v37, 0.0 }
 0xa1a   :  { %504 = vrot.lane.b32.xlu1 %v502_v38, %s2827_s8 }
 0xa8c   :  { %v505_v39 = vpop.permute.xlu1 %504 }
 0xa8d   :  { %v507_v40 = vsel %vm84_vm1, %v505_v39, %v2980_v3 }
 0xa8e   :  { %v508_v42 = vpack.c.bf16 %v507_v40, %v507_v40 }
 0xa90   :  { %2425 = vmatmul.mubr.msk.bf16.vlgmr.msra.gmra.mrb[12].mxu0 %vm236_vm4, %v508_v42 }
 0xa91   :  { %2445 = vmatpush3.bf16.msra.mxu0 %v2920_v17  ;;  %2446 = vmatprep.mubr.msk.bf16.mxu0 %vm2824_vm0, %v2823_v0 }
 0xa92   :  { %2462 = vmatprep.subr.bf16.mxu0 %v2823_v0 }
 0xb63   :  { %v546_v43 = vpop.f32.mrb[12].mxu0 }
 0xb64   :  { %v547_v44 = vadd.f32 %v546_v43, %v2959_v41  ;;  %v2426_v45 = vpop.f32.mrb[13].mxu0 }
 0xb65   :  { %v549_v46 = vpop.f32.mrb[14].mxu0 }
 0xb66   :  { %559 = vrot.lane.b32.xlu0 %v547_v44, %s2828_s10  ;;  %563 = vrot.lane.b32.xlu1 %v547_v44, %s2825_s29  ;;  %v2427_v47 = vpop.f32.mrb[15].mxu0  ;;  %v2226_v48 = vmul.f32 -1.442695, %v547_v44 }
 0xb68   :  { %2673 = vpow2.f32 %v2226_v48 }
 0xb72   :  { %v2674_v49 = vpop.eup %2673 }
 0xb73   :  { %v555_v50 = vadd.f32 1.0, %v2674_v49 }
 0xb75   :  { %2675 = vrcp.f32 %v555_v50 }
 0xb7f   :  { %v2676_v51 = vpop.eup %2675 }
 0xb80   :  { %v573_v61 = vsub.f32 1.0, %v2676_v51  ;;  %v579_v63 = vmul.f32 %v2676_v51, %v2980_v3 }
 0xbd8   :  { %v564_v52 = vpop.permute.xlu1 %563  ;;  %v560_v54 = vpop.permute.xlu0 %559 }
 0xbd9   :  { %v566_v53 = vmul.f32 %v2676_v51, %v564_v52  ;;  %v562_v55 = vsub.f32 %v547_v44, %v560_v54 }
 0xbdb   :  { %568 = vrot.lane.b32.xlu1 %v566_v53, %s2821_s15 }
 0xc4d   :  { %v569_v56 = vpop.permute.xlu1 %568 }
 0xc4e   :  { %v571_v59 = vadd.f32 %v569_v56, %v562_v55 }
 0xc50   :  { %2677 = vtanh.f32 %v571_v59 }
 0xc5a   :  { %v2678_v60 = vpop.eup %2677 }
 0xc5b   :  { %575 = vrot.lane.b32.xlu0 %v2678_v60, %s2828_s10 }
 0xccd   :  { %v576_v62 = vpop.permute.xlu0 %575 }
 0xcce   :  { %v578_v4 = vmul.f32 %v576_v62, %v573_v61 }
 0xcd0   :  { %v3036_v5 = vadd.f32 %v579_v63, %v578_v4 }
 0xcd2   :  { %v581_v7 = vpack.c.bf16 %v3036_v5, %v3036_v5 }
 0xcd4   :  { %583 = vrot.lane.b32.xlu1 %v581_v7, %s2828_s10 }
 0xd46   :  { %v584_v8 = vpop.permute.xlu1 %583 }
 0xd47   :  { %2433 = vmatmul.mubr.msk.bf16.vlgmr.msra.gmra.mrb[12].mxu1 %vm84_vm1, %v584_v8 }
 0xd48   :  { %2437 = vmatpush3.bf16.msra.mxu1 %v2895_v1  ;;  %2440 = vmatprep.mubr.msk.bf16.mxu1 %vm2824_vm0, %v2823_v0 }
 0xd49   :  { %2438 = vmatprep.subr.bf16.mxu1 %v2823_v0 }
 0xd4c   :  { %2439 = vmatpush3.bf16.msra.mxu1 %v2901_v2 }
 0xd4d   :  { %2450 = vmatprep.subr.bf16.mxu1 %v2823_v0 }
 0xd4f   :  { %2441 = vmatmul.mubr.msk.bf16.vlgmr.msra.gmra.mrb[16].mxu1 %vm84_vm1, %v584_v8 }
 0xd50   :  { %2451 = vmatpush3.bf16.msra.mxu1 %v2932_v26  ;;  %2458 = vmatprep.mubr.msk.bf16.mxu1 %vm2824_vm0, %v2823_v0 }
 0xd51   :  { %2452 = vmatprep.subr.bf16.mxu1 %v2823_v0 }
 0xd54   :  { %2453 = vmatpush3.bf16.msra.mxu1 %v2935_v27 }
 0xd55   :  { %2454 = vmatprep.subr.bf16.mxu1 %v2823_v0 }
 0xd58   :  { %2455 = vmatpush3.bf16.msra.mxu1 %v2939_v28 }
 0xd59   :  { %2456 = vmatprep.subr.bf16.mxu1 %v2823_v0 }
 0xd5c   :  { %2457 = vmatpush3.bf16.msra.mxu1 %v2945_v33 }
 0xd5d   :  { %2478 = vmatprep.subr.bf16.mxu1 %v2823_v0 }
 0xe1a   :  { %v3059_v9 = vpop.f32.mrb[12].mxu1 }
 0xe1b   :  { %v2434_v10 = vpop.f32.mrb[13].mxu1 }
 0xe1c   :  { %v625_v11 = vpop.f32.mrb[14].mxu1 }
 0xe1d   :  { %v2435_v12 = vpop.f32.mrb[15].mxu1 }
 0xe22   :  { %v691_v14 = vpop.f32.mrb[16].mxu1 }
 0xe23   :  { %v697_v15 = vadd.f32 %v691_v14, %v656_v13  ;;  %v2442_v16 = vpop.f32.mrb[17].mxu1 }
 0xe24   :  { %v694_v18 = vpop.f32.mrb[18].mxu1 }
 0xe25   :  { %v2443_v19 = vpop.f32.mrb[19].mxu1  ;;  %v698_v21 = vsel %vm129_vm2, %v697_v15, -inf }
 0xe26   :  { %699 = vmax.xlane.f32.xlu0 %v698_v21  ;;  %v912_v21 = vld [vmem:[%s911_s26] sm:$0x1] }
 0xeb3   :  { %v700_v22 = vpop.xlane.xlu0 %699 }
 0xeb4   :  { %v701_v23 = vsub.f32 %v697_v15, %v700_v22 }
 0xeb6   :  { %v702_v24 = vmul.f32 1.442695, %v701_v23 }
 0xeb8   :  { %2679 = vpow2.f32 %v702_v24 }
 0xec2   :  { %v2680_v25 = vpop.eup %2679 }
 0xec3   :  { %v704_v30 = vsel %vm129_vm2, %v2680_v25, 0.0 }
 0xec4   :  { %705 = vadd.xlane.f32.xlu1 %v704_v30 }
 0xf51   :  { %v706_v31 = vpop.xlane.xlu1 %705 }
 0xf52   :  { %2681 = vrcp.f32 %v706_v31 }
 0xf5c   :  { %v2682_v32 = vpop.eup %2681 }
 0xf5d   :  { %v3066_v34 = vmul.f32 %v2682_v32, %v2680_v25 }
 0xf5f   :  { %v709_v35 = vpack.c.bf16 %v3066_v34, %v3066_v34 }
 0xf61   :  { %2447 = vmatmul.mubr.msk.bf16.vlgmr.msra.gmra.mrb[16].mxu0 %vm148_vm3, %v709_v35 }
 0xf62   :  { %2463 = vmatpush3.bf16.msra.mxu0 %v2968_v57  ;;  %2466 = vmatprep.mubr.msk.bf16.mxu0 %vm2824_vm0, %v2823_v0 }
 0xf63   :  { %2464 = vmatprep.subr.bf16.mxu0 %v2823_v0 }
 0xf66   :  { %2465 = vmatpush3.bf16.msra.mxu0 %v2974_v58 }
 0xf67   :  { %2470 = vmatprep.subr.bf16.mxu0 %v2823_v0 }
0x1034   :  { %v747_v36 = vpop.f32.mrb[16].mxu0 }
0x1035   :  { %754 = vrot.lane.b32.xlu0 %v747_v36, %s2826_s30  ;;  %v2448_v37 = vpop.f32.mrb[17].mxu0 }
0x1036   :  { %v750_v38 = vpop.f32.mrb[18].mxu0 }
0x1037   :  { %v2449_v39 = vpop.f32.mrb[19].mxu0 }
0x10a7   :  { %v755_v40 = vpop.permute.xlu0 %754 }
0x10a8   :  { %v757_v42 = vadd.f32 %v755_v40, %v656_v13 }
0x10aa   :  { %v758_v43 = vmax.f32 %v757_v42, 0.0 }
0x10ac   :  { %760 = vrot.lane.b32.xlu1 %v758_v43, %s2827_s8 }
0x111e   :  { %v761_v44 = vpop.permute.xlu1 %760 }
0x111f   :  { %v763_v45 = vsel %vm84_vm1, %v761_v44, %v3036_v5 }
0x1120   :  { %v764_v46 = vpack.c.bf16 %v763_v45, %v763_v45 }
0x1122   :  { %2459 = vmatmul.mubr.msk.bf16.vlgmr.msra.gmra.mrb[20].mxu1 %vm236_vm4, %v764_v46 }
0x1123   :  { %2479 = vmatpush3.bf16.msra.mxu1 %v2920_v17  ;;  %2480 = vmatprep.mubr.msk.bf16.mxu1 %vm2824_vm0, %v2823_v0 }
0x1124   :  { %2496 = vmatprep.subr.bf16.mxu1 %v2823_v0 }
0x11f5   :  { %v802_v47 = vpop.f32.mrb[20].mxu1 }
0x11f6   :  { %v803_v48 = vadd.f32 %v802_v47, %v2959_v41  ;;  %v2460_v49 = vpop.f32.mrb[21].mxu1 }
0x11f7   :  { %v805_v50 = vpop.f32.mrb[22].mxu1 }
0x11f8   :  { %815 = vrot.lane.b32.xlu1 %v803_v48, %s2828_s10  ;;  %819 = vrot.lane.b32.xlu0 %v803_v48, %s2825_s29  ;;  %v2461_v51 = vpop.f32.mrb[23].mxu1  ;;  %v2232_v52 = vmul.f32 -1.442695, %v803_v48 }
0x11fa   :  { %2683 = vpow2.f32 %v2232_v52 }
0x1204   :  { %v2684_v53 = vpop.eup %2683 }
0x1205   :  { %v811_v54 = vadd.f32 1.0, %v2684_v53 }
0x1207   :  { %2685 = vrcp.f32 %v811_v54 }
0x1211   :  { %v2686_v55 = vpop.eup %2685 }
0x1212   :  { %v829_v7 = vsub.f32 1.0, %v2686_v55  ;;  %v835_v10 = vmul.f32 %v2686_v55, %v3036_v5 }
0x126a   :  { %v820_v56 = vpop.permute.xlu0 %819  ;;  %v816_v60 = vpop.permute.xlu1 %815 }
0x126b   :  { %v822_v59 = vmul.f32 %v2686_v55, %v820_v56  ;;  %v818_v61 = vsub.f32 %v803_v48, %v816_v60 }
0x126d   :  { %824 = vrot.lane.b32.xlu0 %v822_v59, %s2821_s15 }
0x12df   :  { %v825_v62 = vpop.permute.xlu0 %824 }
0x12e0   :  { %v827_v63 = vadd.f32 %v825_v62, %v818_v61 }
0x12e2   :  { %2687 = vtanh.f32 %v827_v63 }
0x12ec   :  { %v2688_v4 = vpop.eup %2687 }
0x12ed   :  { %831 = vrot.lane.b32.xlu1 %v2688_v4, %s2828_s10 }
0x135f   :  { %v832_v8 = vpop.permute.xlu1 %831 }
0x1360   :  { %v834_v11 = vmul.f32 %v832_v8, %v829_v7 }
0x1362   :  { %v3092_v12 = vadd.f32 %v835_v10, %v834_v11 }
0x1364   :  { %v837_v13 = vpack.c.bf16 %v3092_v12, %v3092_v12 }
0x1366   :  { %839 = vrot.lane.b32.xlu0 %v837_v13, %s2828_s10 }
0x13d8   :  { %v840_v14 = vpop.permute.xlu0 %839 }
0x13d9   :  { %2467 = vmatmul.mubr.msk.bf16.vlgmr.msra.gmra.mrb[20].mxu0 %vm84_vm1, %v840_v14 }
0x13da   :  { %2471 = vmatpush3.bf16.msra.mxu0 %v2895_v1  ;;  %2474 = vmatprep.mubr.msk.bf16.mxu0 %vm2824_vm0, %v2823_v0 }
0x13db   :  { %2472 = vmatprep.subr.bf16.mxu0 %v2823_v0 }
0x13de   :  { %2473 = vmatpush3.bf16.msra.mxu0 %v2901_v2 }
0x13df   :  { %2484 = vmatprep.subr.bf16.mxu0 %v2823_v0 }
0x13e1   :  { %2475 = vmatmul.mubr.msk.bf16.vlgmr.msra.gmra.mrb[24].mxu0 %vm84_vm1, %v840_v14 }
0x13e2   :  { %2485 = vmatpush3.bf16.msra.mxu0 %v2932_v26  ;;  %2492 = vmatprep.mubr.msk.bf16.mxu0 %vm2824_vm0, %v2823_v0 }
0x13e3   :  { %2486 = vmatprep.subr.bf16.mxu0 %v2823_v0 }
0x13e6   :  { %2487 = vmatpush3.bf16.msra.mxu0 %v2935_v27 }
0x13e7   :  { %2488 = vmatprep.subr.bf16.mxu0 %v2823_v0 }
0x13ea   :  { %2489 = vmatpush3.bf16.msra.mxu0 %v2939_v28 }
0x13eb   :  { %2490 = vmatprep.subr.bf16.mxu0 %v2823_v0 }
0x13ee   :  { %2491 = vmatpush3.bf16.msra.mxu0 %v2945_v33 }
0x13ef   :  { %2512 = vmatprep.subr.bf16.mxu0 %v2823_v0 }
0x14ac   :  { %v3115_v15 = vpop.f32.mrb[20].mxu0 }
0x14ad   :  { %v2468_v16 = vpop.f32.mrb[21].mxu0 }
0x14ae   :  { %v881_v18 = vpop.f32.mrb[22].mxu0 }
0x14af   :  { %v2469_v19 = vpop.f32.mrb[23].mxu0 }
0x14b4   :  { %v947_v22 = vpop.f32.mrb[24].mxu0 }
0x14b5   :  { %v953_v23 = vadd.f32 %v947_v22, %v912_v21  ;;  %v2476_v24 = vpop.f32.mrb[25].mxu0 }
0x14b6   :  { %v950_v25 = vpop.f32.mrb[26].mxu0 }
0x14b7   :  { %v2477_v30 = vpop.f32.mrb[27].mxu0  ;;  %v954_v31 = vsel %vm129_vm2, %v953_v23, -inf }
0x14b8   :  { %955 = vmax.xlane.f32.xlu1 %v954_v31 }
0x1545   :  { %v956_v32 = vpop.xlane.xlu1 %955 }
0x1546   :  { %v957_v35 = vsub.f32 %v953_v23, %v956_v32  ;;  %v1168_v32 = vld [vmem:[%s1167_s9] sm:$0x1] }
0x1548   :  { %v958_v36 = vmul.f32 1.442695, %v957_v35 }
0x154a   :  { %2689 = vpow2.f32 %v958_v36 }
0x1554   :  { %v2690_v37 = vpop.eup %2689 }
0x1555   :  { %v960_v38 = vsel %vm129_vm2, %v2690_v37, 0.0 }
0x1556   :  { %961 = vadd.xlane.f32.xlu0 %v960_v38 }
0x15e3   :  { %v962_v39 = vpop.xlane.xlu0 %961 }
0x15e4   :  { %2691 = vrcp.f32 %v962_v39 }
0x15ee   :  { %v2692_v40 = vpop.eup %2691 }
0x15ef   :  { %v3122_v42 = vmul.f32 %v2692_v40, %v2690_v37 }
0x15f1   :  { %v965_v43 = vpack.c.bf16 %v3122_v42, %v3122_v42 }
0x15f3   :  { %2481 = vmatmul.mubr.msk.bf16.vlgmr.msra.gmra.mrb[24].mxu1 %vm148_vm3, %v965_v43 }
0x15f4   :  { %2497 = vmatpush3.bf16.msra.mxu1 %v2968_v57  ;;  %2500 = vmatprep.mubr.msk.bf16.mxu1 %vm2824_vm0, %v2823_v0 }
0x15f5   :  { %2498 = vmatprep.subr.bf16.mxu1 %v2823_v0 }
0x15f8   :  { %2499 = vmatpush3.bf16.msra.mxu1 %v2974_v58 }
0x15f9   :  { %2504 = vmatprep.subr.bf16.mxu1 %v2823_v0 }
0x16c6   :  { %v1003_v44 = vpop.f32.mrb[24].mxu1 }
0x16c7   :  { %1010 = vrot.lane.b32.xlu0 %v1003_v44, %s2826_s30  ;;  %v2482_v45 = vpop.f32.mrb[25].mxu1 }
0x16c8   :  { %v1006_v46 = vpop.f32.mrb[26].mxu1 }
0x16c9   :  { %v2483_v47 = vpop.f32.mrb[27].mxu1 }
0x1739   :  { %v1011_v48 = vpop.permute.xlu0 %1010 }
0x173a   :  { %v1013_v49 = vadd.f32 %v1011_v48, %v912_v21 }
0x173c   :  { %v1014_v50 = vmax.f32 %v1013_v49, 0.0 }
0x173e   :  { %1016 = vrot.lane.b32.xlu1 %v1014_v50, %s2827_s8 }
0x17b0   :  { %v1017_v51 = vpop.permute.xlu1 %1016 }
0x17b1   :  { %v1019_v52 = vsel %vm84_vm1, %v1017_v51, %v3092_v12 }
0x17b2   :  { %v1020_v53 = vpack.c.bf16 %v1019_v52, %v1019_v52 }
0x17b4   :  { %2493 = vmatmul.mubr.msk.bf16.vlgmr.msra.gmra.mrb[28].mxu0 %vm236_vm4, %v1020_v53 }
0x17b5   :  { %2513 = vmatpush3.bf16.msra.mxu0 %v2920_v17  ;;  %2514 = vmatprep.mubr.msk.bf16.mxu0 %vm2824_vm0, %v2823_v0 }
0x17b6   :  { %2530 = vmatprep.subr.bf16.mxu0 %v2823_v0 }
0x1887   :  { %v1058_v54 = vpop.f32.mrb[28].mxu0 }
0x1888   :  { %v1059_v55 = vadd.f32 %v1058_v54, %v2959_v41  ;;  %v2494_v56 = vpop.f32.mrb[29].mxu0 }
0x1889   :  { %v1061_v59 = vpop.f32.mrb[30].mxu0 }
0x188a   :  { %1071 = vrot.lane.b32.xlu0 %v1059_v55, %s2828_s10  ;;  %1075 = vrot.lane.b32.xlu1 %v1059_v55, %s2825_s29  ;;  %v2495_v60 = vpop.f32.mrb[31].mxu0  ;;  %v2238_v61 = vmul.f32 -1.442695, %v1059_v55 }
0x188c   :  { %2693 = vpow2.f32 %v2238_v61 }
0x1896   :  { %v2694_v62 = vpop.eup %2693 }
0x1897   :  { %v1067_v63 = vadd.f32 1.0, %v2694_v62 }
0x1899   :  { %2695 = vrcp.f32 %v1067_v63 }
0x18a3   :  { %v2696_v4 = vpop.eup %2695 }
0x18a4   :  { %v1085_v18 = vsub.f32 1.0, %v2696_v4  ;;  %v1091_v21 = vmul.f32 %v2696_v4, %v3092_v12 }
0x18fc   :  { %v1076_v7 = vpop.permute.xlu1 %1075  ;;  %v1072_v10 = vpop.permute.xlu0 %1071 }
0x18fd   :  { %v1078_v8 = vmul.f32 %v2696_v4, %v1076_v7  ;;  %v1074_v11 = vsub.f32 %v1059_v55, %v1072_v10 }
0x18ff   :  { %1080 = vrot.lane.b32.xlu1 %v1078_v8, %s2821_s15 }
0x1971   :  { %v1081_v13 = vpop.permute.xlu1 %1080 }
0x1972   :  { %v1083_v14 = vadd.f32 %v1081_v13, %v1074_v11 }
0x1974   :  { %2697 = vtanh.f32 %v1083_v14 }
0x197e   :  { %v2698_v16 = vpop.eup %2697 }
0x197f   :  { %1087 = vrot.lane.b32.xlu0 %v2698_v16, %s2828_s10 }
0x19f1   :  { %v1088_v19 = vpop.permute.xlu0 %1087 }
0x19f2   :  { %v1090_v22 = vmul.f32 %v1088_v19, %v1085_v18 }
0x19f4   :  { %v3148_v23 = vadd.f32 %v1091_v21, %v1090_v22 }
0x19f6   :  { %v1093_v24 = vpack.c.bf16 %v3148_v23, %v3148_v23 }
0x19f8   :  { %1095 = vrot.lane.b32.xlu1 %v1093_v24, %s2828_s10 }
0x1a6a   :  { %v1096_v25 = vpop.permute.xlu1 %1095 }
0x1a6b   :  { %2501 = vmatmul.mubr.msk.bf16.vlgmr.msra.gmra.mrb[28].mxu1 %vm84_vm1, %v1096_v25 }
0x1a6c   :  { %2505 = vmatpush3.bf16.msra.mxu1 %v2895_v1  ;;  %2508 = vmatprep.mubr.msk.bf16.mxu1 %vm2824_vm0, %v2823_v0 }
0x1a6d   :  { %2506 = vmatprep.subr.bf16.mxu1 %v2823_v0 }
0x1a70   :  { %2507 = vmatpush3.bf16.msra.mxu1 %v2901_v2 }
0x1a71   :  { %2518 = vmatprep.subr.bf16.mxu1 %v2823_v0 }
0x1a73   :  { %2509 = vmatmul.mubr.msk.bf16.vlgmr.msra.gmra.mrb[32].mxu1 %vm84_vm1, %v1096_v25 }
0x1a74   :  { %2519 = vmatpush3.bf16.msra.mxu1 %v2932_v26  ;;  %2526 = vmatprep.mubr.msk.bf16.mxu1 %vm2824_vm0, %v2823_v0 }
0x1a75   :  { %2520 = vmatprep.subr.bf16.mxu1 %v2823_v0 }
0x1a78   :  { %2521 = vmatpush3.bf16.msra.mxu1 %v2935_v27 }
0x1a79   :  { %2522 = vmatprep.subr.bf16.mxu1 %v2823_v0 }
0x1a7c   :  { %2523 = vmatpush3.bf16.msra.mxu1 %v2939_v28 }
0x1a7d   :  { %2524 = vmatprep.subr.bf16.mxu1 %v2823_v0 }
0x1a80   :  { %2525 = vmatpush3.bf16.msra.mxu1 %v2945_v33 }
0x1a81   :  { %2546 = vmatprep.subr.bf16.mxu1 %v2823_v0 }
0x1b3e   :  { %v3171_v1 = vpop.f32.mrb[28].mxu1 }
0x1b3f   :  { %v2502_v2 = vpop.f32.mrb[29].mxu1 }
0x1b40   :  { %v1137_v30 = vpop.f32.mrb[30].mxu1 }
0x1b41   :  { %v2503_v31 = vpop.f32.mrb[31].mxu1 }
0x1b46   :  { %v1203_v35 = vpop.f32.mrb[32].mxu1 }
0x1b47   :  { %v1209_v36 = vadd.f32 %v1203_v35, %v1168_v32  ;;  %v2510_v37 = vpop.f32.mrb[33].mxu1 }
0x1b48   :  { %v1206_v38 = vpop.f32.mrb[34].mxu1 }
0x1b49   :  { %v2511_v39 = vpop.f32.mrb[35].mxu1  ;;  %v1210_v40 = vsel %vm129_vm2, %v1209_v36, -inf }
0x1b4a   :  { %1211 = vmax.xlane.f32.xlu0 %v1210_v40  ;;  %v3213_v39 = vld [vmem:[%s3600_s2] sm:$0xff]   ;;  %v3222_v40 = vld [vmem:[%s3600_s2 + $0x8] sm:$0xff]  }
0x1bd7   :  { %v1212_v43 = vpop.xlane.xlu0 %1211 }
0x1bd8   :  { %v1213_v44 = vsub.f32 %v1209_v36, %v1212_v43 }
0x1bda   :  { %v1214_v45 = vmul.f32 1.442695, %v1213_v44 }
0x1bdc   :  { %2699 = vpow2.f32 %v1214_v45 }
0x1be6   :  { %v2700_v46 = vpop.eup %2699 }
0x1be7   :  { %v1216_v47 = vsel %vm129_vm2, %v2700_v46, 0.0 }
0x1be8   :  { %1217 = vadd.xlane.f32.xlu1 %v1216_v47 }
0x1c75   :  { %v1218_v48 = vpop.xlane.xlu1 %1217 }
0x1c76   :  { %2701 = vrcp.f32 %v1218_v48 }
0x1c80   :  { %v2702_v49 = vpop.eup %2701 }
0x1c81   :  { %v3178_v50 = vmul.f32 %v2702_v49, %v2700_v46 }
0x1c83   :  { %v1221_v51 = vpack.c.bf16 %v3178_v50, %v3178_v50 }
0x1c85   :  { %2515 = vmatmul.mubr.msk.bf16.vlgmr.msra.gmra.mrb[32].mxu0 %vm148_vm3, %v1221_v51 }
0x1c86   :  { %2531 = vmatpush3.bf16.msra.mxu0 %v2968_v57  ;;  %2534 = vmatprep.mubr.msk.bf16.mxu0 %vm2824_vm0, %v2823_v0 }
0x1c87   :  { %2532 = vmatprep.subr.bf16.mxu0 %v2823_v0 }
0x1c8a   :  { %2533 = vmatpush3.bf16.msra.mxu0 %v2974_v58 }
0x1c8b   :  { %2538 = vmatprep.subr.bf16.mxu0 %v2823_v0 }
0x1d58   :  { %v1259_v52 = vpop.f32.mrb[32].mxu0 }
0x1d59   :  { %1266 = vrot.lane.b32.xlu0 %v1259_v52, %s2826_s30  ;;  %v2516_v53 = vpop.f32.mrb[33].mxu0 }
0x1d5a   :  { %v1262_v54 = vpop.f32.mrb[34].mxu0 }
0x1d5b   :  { %v2517_v55 = vpop.f32.mrb[35].mxu0 }
0x1dcb   :  { %v1267_v56 = vpop.permute.xlu0 %1266 }
0x1dcc   :  { %v1269_v59 = vadd.f32 %v1267_v56, %v1168_v32 }
0x1dce   :  { %v1270_v60 = vmax.f32 %v1269_v59, 0.0 }
0x1dd0   :  { %1272 = vrot.lane.b32.xlu1 %v1270_v60, %s2827_s8 }
0x1e42   :  { %v1273_v61 = vpop.permute.xlu1 %1272 }
0x1e43   :  { %v1275_v62 = vsel %vm84_vm1, %v1273_v61, %v3148_v23 }
0x1e44   :  { %v1276_v63 = vpack.c.bf16 %v1275_v62, %v1275_v62 }
0x1e46   :  { %2527 = vmatmul.mubr.msk.bf16.vlgmr.msra.gmra.mrb[36].mxu1 %vm236_vm4, %v1276_v63 }
0x1e47   :  { %2547 = vmatpush3.bf16.msra.mxu1 %v2920_v17  ;;  %2548 = vmatprep.mubr.msk.bf16.mxu1 %vm2824_vm0, %v2823_v0 }
0x1e48   :  { %2564 = vmatprep.subr.bf16.mxu1 %v2823_v0 }
0x1f19   :  { %v1314_v4 = vpop.f32.mrb[36].mxu1 }
0x1f1a   :  { %v1315_v7 = vadd.f32 %v1314_v4, %v2959_v41  ;;  %v2528_v8 = vpop.f32.mrb[37].mxu1 }
0x1f1b   :  { %v1317_v10 = vpop.f32.mrb[38].mxu1 }
0x1f1c   :  { %1327 = vrot.lane.b32.xlu1 %v1315_v7, %s2828_s10  ;;  %1331 = vrot.lane.b32.xlu0 %v1315_v7, %s2825_s29  ;;  %v2529_v11 = vpop.f32.mrb[39].mxu1  ;;  %v2244_v13 = vmul.f32 -1.442695, %v1315_v7 }
0x1f1e   :  { %2703 = vpow2.f32 %v2244_v13 }
0x1f28   :  { %v2704_v14 = vpop.eup %2703 }
0x1f29   :  { %v1323_v16 = vadd.f32 1.0, %v2704_v14 }
0x1f2b   :  { %2705 = vrcp.f32 %v1323_v16 }
0x1f35   :  { %v2706_v17 = vpop.eup %2705 }
0x1f36   :  { %v1341_v30 = vsub.f32 1.0, %v2706_v17  ;;  %v1347_v32 = vmul.f32 %v2706_v17, %v3148_v23 }
0x1f8e   :  { %v1332_v18 = vpop.permute.xlu0 %1331  ;;  %v1328_v21 = vpop.permute.xlu1 %1327 }
0x1f8f   :  { %v1334_v19 = vmul.f32 %v2706_v17, %v1332_v18  ;;  %v1330_v22 = vsub.f32 %v1315_v7, %v1328_v21 }
0x1f91   :  { %1336 = vrot.lane.b32.xlu0 %v1334_v19, %s2821_s15 }
0x2003   :  { %v1337_v24 = vpop.permute.xlu0 %1336 }
0x2004   :  { %v1339_v25 = vadd.f32 %v1337_v24, %v1330_v22 }
0x2006   :  { %2707 = vtanh.f32 %v1339_v25 }
0x2010   :  { %v2708_v2 = vpop.eup %2707 }
0x2011   :  { %1343 = vrot.lane.b32.xlu1 %v2708_v2, %s2828_s10 }
0x2083   :  { %v1344_v31 = vpop.permute.xlu1 %1343 }
0x2084   :  { %v1346_v35 = vmul.f32 %v1344_v31, %v1341_v30 }
0x2086   :  { %v3204_v36 = vadd.f32 %v1347_v32, %v1346_v35 }
0x2088   :  { %v1349_v37 = vpack.c.bf16 %v3204_v36, %v3204_v36 }
0x208a   :  { %1351 = vrot.lane.b32.xlu0 %v1349_v37, %s2828_s10 }
0x20fc   :  { %v1352_v38 = vpop.permute.xlu0 %1351 }
0x20fd   :  { %2535 = vmatmul.mubr.msk.bf16.vlgmr.msra.gmra.mrb[36].mxu0 %vm84_vm1, %v1352_v38 }
0x20fe   :  { %2539 = vmatpush3.bf16.msra.mxu0 %v3213_v39  ;;  %2542 = vmatprep.mubr.msk.bf16.mxu0 %vm2824_vm0, %v2823_v0 }
0x20ff   :  { %2540 = vmatprep.subr.bf16.mxu0 %v2823_v0 }
0x2102   :  { %2541 = vmatpush3.bf16.msra.mxu0 %v3222_v40 }
0x2103   :  { %2552 = vmatprep.subr.bf16.mxu0 %v2823_v0 }
0x2105   :  { %2543 = vmatmul.mubr.msk.bf16.vlgmr.msra.gmra.mrb[40].mxu0 %vm84_vm1, %v1352_v38 }
0x2106   :  { %2553 = vmatpush3.bf16.msra.mxu0 %v2932_v26  ;;  %2560 = vmatprep.mubr.msk.bf16.mxu0 %vm2824_vm0, %v2823_v0 }
0x2107   :  { %2554 = vmatprep.subr.bf16.mxu0 %v2823_v0 }
0x210a   :  { %2555 = vmatpush3.bf16.msra.mxu0 %v2935_v27  ;;  %v1424_v27 = vld [vmem:[%s1423_s18] sm:$0x1] }
0x210b   :  { %2556 = vmatprep.subr.bf16.mxu0 %v2823_v0 }
0x210e   :  { %2557 = vmatpush3.bf16.msra.mxu0 %v2939_v28 }
0x210f   :  { %2558 = vmatprep.subr.bf16.mxu0 %v2823_v0 }
0x2112   :  { %2559 = vmatpush3.bf16.msra.mxu0 %v2945_v33 }
0x2113   :  { %2580 = vmatprep.subr.bf16.mxu0 %v2823_v0 }
0x21d0   :  { %v3237_v43 = vpop.f32.mrb[36].mxu0 }
0x21d1   :  { %v2536_v26 = vpop.f32.mrb[37].mxu0 }
0x21d2   :  { %v1393_v44 = vpop.f32.mrb[38].mxu0 }
0x21d3   :  { %v2537_v45 = vpop.f32.mrb[39].mxu0 }
0x21d8   :  { %v1459_v46 = vpop.f32.mrb[40].mxu0 }
0x21d9   :  { %v1465_v47 = vadd.f32 %v1459_v46, %v1424_v27  ;;  %v2544_v28 = vpop.f32.mrb[41].mxu0 }
0x21da   :  { %v1462_v48 = vpop.f32.mrb[42].mxu0 }
0x21db   :  { %v2545_v49 = vpop.f32.mrb[43].mxu0  ;;  %v1466_v33 = vsel %vm129_vm2, %v1465_v47, -inf  ;;  %v3288_v48 = vld [vmem:[#allocation4] sm:$0xff]  }
0x21dc   :  { %1467 = vmax.xlane.f32.xlu1 %v1466_v33  ;;  %v3294_v49 = vld [vmem:[#allocation4 + $0x8] sm:$0xff]   ;;  %v3298_v33 = vld [vmem:[#allocation4 + $0x10] sm:$0xff]  }
0x2269   :  { %v1468_v51 = vpop.xlane.xlu1 %1467 }
0x226a   :  { %v1469_v52 = vsub.f32 %v1465_v47, %v1468_v51  ;;  %v3302_v51 = vld [vmem:[#allocation4 + $0x18] sm:$0xff]  }
0x226c   :  { %v1470_v53 = vmul.f32 1.442695, %v1469_v52 }
0x226e   :  { %2709 = vpow2.f32 %v1470_v53 }
0x2278   :  { %v2710_v54 = vpop.eup %2709 }
0x2279   :  { %v1472_v55 = vsel %vm129_vm2, %v2710_v54, 0.0 }
0x227a   :  { %1473 = vadd.xlane.f32.xlu0 %v1472_v55 }
0x2307   :  { %v1474_v56 = vpop.xlane.xlu0 %1473 }
0x2308   :  { %2711 = vrcp.f32 %v1474_v56 }
0x2312   :  { %v2712_v59 = vpop.eup %2711 }
0x2313   :  { %v3244_v60 = vmul.f32 %v2712_v59, %v2710_v54 }
0x2315   :  { %v1477_v61 = vpack.c.bf16 %v3244_v60, %v3244_v60 }
0x2317   :  { %2549 = vmatmul.mubr.msk.bf16.vlgmr.msra.gmra.mrb[40].mxu1 %vm148_vm3, %v1477_v61 }
0x2318   :  { %2565 = vmatpush3.bf16.msra.mxu1 %v2968_v57  ;;  %2568 = vmatprep.mubr.msk.bf16.mxu1 %vm2824_vm0, %v2823_v0 }
0x2319   :  { %2566 = vmatprep.subr.bf16.mxu1 %v2823_v0 }
0x231c   :  { %2567 = vmatpush3.bf16.msra.mxu1 %v2974_v58  ;;  %v3263_v58 = vld [vmem:[%s3602_s4] sm:$0xff]   ;;  %s2252_s4 = sld [smem:[#allocation3 + $0x6]] }
0x231d   :  { %2572 = vmatprep.subr.bf16.mxu1 %v2823_v0 }
0x2322   :  { %s1679_s22 = scalar_lea.vmem %s3599_s1, %s2252_s4 }
0x2323   :  { %v1680_v56 = vld [vmem:[%s1679_s22] sm:$0x1] }
0x23ea   :  { %v1515_v62 = vpop.f32.mrb[40].mxu1 }
0x23eb   :  { %1522 = vrot.lane.b32.xlu0 %v1515_v62, %s2826_s30  ;;  %v2550_v63 = vpop.f32.mrb[41].mxu1 }
0x23ec   :  { %v1518_v4 = vpop.f32.mrb[42].mxu1 }
0x23ed   :  { %v2551_v7 = vpop.f32.mrb[43].mxu1 }
0x245d   :  { %v1523_v8 = vpop.permute.xlu0 %1522 }
0x245e   :  { %v1525_v10 = vadd.f32 %v1523_v8, %v1424_v27 }
0x2460   :  { %v1526_v11 = vmax.f32 %v1525_v10, 0.0 }
0x2462   :  { %1528 = vrot.lane.b32.xlu1 %v1526_v11, %s2827_s8 }
0x24d4   :  { %v1529_v57 = vpop.permute.xlu1 %1528 }
0x24d5   :  { %v1531_v13 = vsel %vm84_vm1, %v1529_v57, %v3204_v36 }
0x24d6   :  { %v1532_v14 = vpack.c.bf16 %v1531_v13, %v1531_v13 }
0x24d8   :  { %2561 = vmatmul.mubr.msk.bf16.vlgmr.msra.gmra.mrb[44].mxu0 %vm236_vm4, %v1532_v14 }
0x24d9   :  { %2581 = vmatpush3.bf16.msra.mxu0 %v3263_v58  ;;  %2582 = vmatprep.mubr.msk.bf16.mxu0 %vm2824_vm0, %v2823_v0 }
0x24da   :  { %2598 = vmatprep.subr.bf16.mxu0 %v2823_v0 }
0x25ab   :  { %v1570_v16 = vpop.f32.mrb[44].mxu0 }
0x25ac   :  { %v1571_v17 = vadd.f32 %v1570_v16, %v2959_v41  ;;  %v2562_v18 = vpop.f32.mrb[45].mxu0 }
0x25ad   :  { %v1573_v19 = vpop.f32.mrb[46].mxu0 }
0x25ae   :  { %1583 = vrot.lane.b32.xlu0 %v1571_v17, %s2828_s10  ;;  %1587 = vrot.lane.b32.xlu1 %v1571_v17, %s2825_s29  ;;  %v2563_v21 = vpop.f32.mrb[47].mxu0  ;;  %v2250_v22 = vmul.f32 -1.442695, %v1571_v17  ;;  %v3321_v19 = vld [vmem:[%s3600_s2 + $0x10] sm:$0xff]  }
0x25af   :  { %v3330_v21 = vld [vmem:[%s3600_s2 + $0x18] sm:$0xff]  }
0x25b0   :  { %2713 = vpow2.f32 %v2250_v22 }
0x25ba   :  { %v2714_v24 = vpop.eup %2713 }
0x25bb   :  { %v1579_v25 = vadd.f32 1.0, %v2714_v24 }
0x25bd   :  { %2715 = vrcp.f32 %v1579_v25 }
0x25c7   :  { %v2716_v2 = vpop.eup %2715 }
0x25c8   :  { %v1597_v26 = vsub.f32 1.0, %v2716_v2  ;;  %v1603_v45 = vmul.f32 %v2716_v2, %v3204_v36 }
0x2620   :  { %v1588_v30 = vpop.permute.xlu1 %1587  ;;  %v1584_v32 = vpop.permute.xlu0 %1583 }
0x2621   :  { %v1590_v31 = vmul.f32 %v2716_v2, %v1588_v30  ;;  %v1586_v35 = vsub.f32 %v1571_v17, %v1584_v32 }
0x2623   :  { %1592 = vrot.lane.b32.xlu1 %v1590_v31, %s2821_s15 }
0x2695   :  { %v1593_v41 = vpop.permute.xlu1 %1592 }
0x2696   :  { %v1595_v37 = vadd.f32 %v1593_v41, %v1586_v35 }
0x2698   :  { %2717 = vtanh.f32 %v1595_v37 }
0x26a2   :  { %v2718_v38 = vpop.eup %2717 }
0x26a3   :  { %1599 = vrot.lane.b32.xlu0 %v2718_v38, %s2828_s10 }
0x2715   :  { %v1600_v44 = vpop.permute.xlu0 %1599 }
0x2716   :  { %v1602_v27 = vmul.f32 %v1600_v44, %v1597_v26  ;;  %v3346_v26 = vld [vmem:[%s3603_s5] sm:$0x1] }
0x2718   :  { %v3275_v46 = vadd.f32 %v1603_v45, %v1602_v27 }
0x271a   :  { %v1605_v47 = vpack.c.bf16 %v3275_v46, %v3275_v46 }
0x271c   :  { %1607 = vrot.lane.b32.xlu1 %v1605_v47, %s2828_s10 }
0x278e   :  { %v1608_v28 = vpop.permute.xlu1 %1607 }
0x278f   :  { %2569 = vmatmul.mubr.msk.bf16.vlgmr.msra.gmra.mrb[44].mxu1 %vm84_vm1, %v1608_v28 }
0x2790   :  { %2573 = vmatpush3.bf16.msra.mxu1 %v3213_v39  ;;  %2576 = vmatprep.mubr.msk.bf16.mxu1 %vm2824_vm0, %v2823_v0 }
0x2791   :  { %2574 = vmatprep.subr.bf16.mxu1 %v2823_v0 }
0x2794   :  { %2575 = vmatpush3.bf16.msra.mxu1 %v3222_v40 }
0x2795   :  { %2586 = vmatprep.subr.bf16.mxu1 %v2823_v0 }
0x2797   :  { %2577 = vmatmul.mubr.msk.bf16.vlgmr.msra.gmra.mrb[48].mxu1 %vm84_vm1, %v1608_v28 }
0x2798   :  { %2587 = vmatpush3.bf16.msra.mxu1 %v3288_v48  ;;  %2594 = vmatprep.mubr.msk.bf16.mxu1 %vm2824_vm0, %v2823_v0 }
0x2799   :  { %2588 = vmatprep.subr.bf16.mxu1 %v2823_v0 }
0x279c   :  { %2589 = vmatpush3.bf16.msra.mxu1 %v3294_v49 }
0x279d   :  { %2590 = vmatprep.subr.bf16.mxu1 %v2823_v0 }
0x27a0   :  { %2591 = vmatpush3.bf16.msra.mxu1 %v3298_v33 }
0x27a1   :  { %2592 = vmatprep.subr.bf16.mxu1 %v2823_v0 }
0x27a4   :  { %2593 = vmatpush3.bf16.msra.mxu1 %v3302_v51 }
0x27a5   :  { %2614 = vmatprep.subr.bf16.mxu1 %v2823_v0 }
0x2862   :  { %v3306_v52 = vpop.f32.mrb[44].mxu1 }
0x2863   :  { %v2570_v53 = vpop.f32.mrb[45].mxu1 }
0x2864   :  { %v1649_v54 = vpop.f32.mrb[46].mxu1 }
0x2865   :  { %v2571_v55 = vpop.f32.mrb[47].mxu1 }
0x286a   :  { %v1715_v59 = vpop.f32.mrb[48].mxu1 }
0x286b   :  { %v1721_v61 = vadd.f32 %v1715_v59, %v1680_v56  ;;  %v2578_v62 = vpop.f32.mrb[49].mxu1 }
0x286c   :  { %v1718_v63 = vpop.f32.mrb[50].mxu1 }
0x286d   :  { %v2579_v4 = vpop.f32.mrb[51].mxu1  ;;  %v1722_v7 = vsel %vm129_vm2, %v1721_v61, -inf }
0x286e   :  { %1723 = vmax.xlane.f32.xlu0 %v1722_v7 }
0x28fb   :  { %v1724_v8 = vpop.xlane.xlu0 %1723 }
0x28fc   :  { %v1725_v10 = vsub.f32 %v1721_v61, %v1724_v8 }
0x28fe   :  { %v1726_v11 = vmul.f32 1.442695, %v1725_v10 }
0x2900   :  { %2719 = vpow2.f32 %v1726_v11 }
0x290a   :  { %v2720_v57 = vpop.eup %2719 }
0x290b   :  { %v1728_v13 = vsel %vm129_vm2, %v2720_v57, 0.0 }
0x290c   :  { %1729 = vadd.xlane.f32.xlu1 %v1728_v13 }
0x2999   :  { %v1730_v14 = vpop.xlane.xlu1 %1729 }
0x299a   :  { %2721 = vrcp.f32 %v1730_v14 }
0x29a4   :  { %v2722_v16 = vpop.eup %2721 }
0x29a5   :  { %v3313_v17 = vmul.f32 %v2722_v16, %v2720_v57 }
0x29a7   :  { %v1733_v18 = vpack.c.bf16 %v3313_v17, %v3313_v17 }
0x29a9   :  { %2583 = vmatmul.mubr.msk.bf16.vlgmr.msra.gmra.mrb[48].mxu0 %vm148_vm3, %v1733_v18  ;;  %v1936_v18 = vld [vmem:[%s1935_s0] sm:$0x1] }
0x29aa   :  { %2599 = vmatpush3.bf16.msra.mxu0 %v3321_v19  ;;  %2602 = vmatprep.mubr.msk.bf16.mxu0 %vm2824_vm0, %v2823_v0 }
0x29ab   :  { %2600 = vmatprep.subr.bf16.mxu0 %v2823_v0 }
0x29ae   :  { %2601 = vmatpush3.bf16.msra.mxu0 %v3330_v21 }
0x29af   :  { %2606 = vmatprep.subr.bf16.mxu0 %v2823_v0 }
0x2a7c   :  { %v1771_v22 = vpop.f32.mrb[48].mxu0 }
0x2a7d   :  { %1778 = vrot.lane.b32.xlu0 %v1771_v22, %s2826_s30  ;;  %v2584_v24 = vpop.f32.mrb[49].mxu0 }
0x2a7e   :  { %v1774_v25 = vpop.f32.mrb[50].mxu0 }
0x2a7f   :  { %v2585_v2 = vpop.f32.mrb[51].mxu0 }
0x2aef   :  { %v1779_v30 = vpop.permute.xlu0 %1778 }
0x2af0   :  { %v1781_v31 = vadd.f32 %v1779_v30, %v1680_v56 }
0x2af2   :  { %v1782_v32 = vmax.f32 %v1781_v31, 0.0 }
0x2af4   :  { %1784 = vrot.lane.b32.xlu1 %v1782_v32, %s2827_s8 }
0x2b66   :  { %v1785_v35 = vpop.permute.xlu1 %1784 }
0x2b67   :  { %v1787_v41 = vsel %vm84_vm1, %v1785_v35, %v3275_v46 }
0x2b68   :  { %v1788_v37 = vpack.c.bf16 %v1787_v41, %v1787_v41 }
0x2b6a   :  { %2595 = vmatmul.mubr.msk.bf16.vlgmr.msra.gmra.mrb[52].mxu1 %vm236_vm4, %v1788_v37 }
0x2b6b   :  { %2615 = vmatpush3.bf16.msra.mxu1 %v3263_v58  ;;  %2616 = vmatprep.mubr.msk.bf16.mxu1 %vm2824_vm0, %v2823_v0 }
0x2b6c   :  { %2632 = vmatprep.subr.bf16.mxu1 %v2823_v0 }
0x2c3d   :  { %v1826_v38 = vpop.f32.mrb[52].mxu1 }
0x2c3e   :  { %v1827_v44 = vadd.f32 %v3346_v26, %v1826_v38  ;;  %v2596_v45 = vpop.f32.mrb[53].mxu1 }
0x2c3f   :  { %v1829_v27 = vpop.f32.mrb[54].mxu1 }
0x2c40   :  { %1839 = vrot.lane.b32.xlu1 %v1827_v44, %s2828_s10  ;;  %1843 = vrot.lane.b32.xlu0 %v1827_v44, %s2825_s29  ;;  %v2597_v58 = vpop.f32.mrb[55].mxu1  ;;  %v2256_v47 = vmul.f32 -1.442695, %v1827_v44 }
0x2c42   :  { %2723 = vpow2.f32 %v2256_v47 }
0x2c4c   :  { %v2724_v28 = vpop.eup %2723 }
0x2c4d   :  { %v1835_v53 = vadd.f32 1.0, %v2724_v28 }
0x2c4f   :  { %2725 = vrcp.f32 %v1835_v53 }
0x2c59   :  { %v2726_v54 = vpop.eup %2725 }
0x2c5a   :  { %v1853_v7 = vsub.f32 1.0, %v2726_v54  ;;  %v1859_v10 = vmul.f32 %v2726_v54, %v3275_v46 }
0x2cb2   :  { %v1844_v55 = vpop.permute.xlu0 %1843  ;;  %v1840_v59 = vpop.permute.xlu1 %1839 }
0x2cb3   :  { %v1846_v56 = vmul.f32 %v2726_v54, %v1844_v55  ;;  %v1842_v61 = vsub.f32 %v1827_v44, %v1840_v59 }
0x2cb5   :  { %1848 = vrot.lane.b32.xlu0 %v1846_v56, %s2821_s15 }
0x2d27   :  { %v1849_v62 = vpop.permute.xlu0 %1848 }
0x2d28   :  { %v1851_v63 = vadd.f32 %v1849_v62, %v1842_v61 }
0x2d2a   :  { %2727 = vtanh.f32 %v1851_v63 }
0x2d34   :  { %v2728_v4 = vpop.eup %2727 }
0x2d35   :  { %1855 = vrot.lane.b32.xlu1 %v2728_v4, %s2828_s10 }
0x2da7   :  { %v1856_v8 = vpop.permute.xlu1 %1855 }
0x2da8   :  { %v1858_v11 = vmul.f32 %v1856_v8, %v1853_v7 }
0x2daa   :  { %v3354_v57 = vadd.f32 %v1859_v10, %v1858_v11 }
0x2dac   :  { %v1861_v13 = vpack.c.bf16 %v3354_v57, %v3354_v57 }
0x2dae   :  { %1863 = vrot.lane.b32.xlu0 %v1861_v13, %s2828_s10 }
0x2e20   :  { %v1864_v14 = vpop.permute.xlu0 %1863 }
0x2e21   :  { %2603 = vmatmul.mubr.msk.bf16.vlgmr.msra.gmra.mrb[52].mxu0 %vm84_vm1, %v1864_v14 }
0x2e22   :  { %2607 = vmatpush3.bf16.msra.mxu0 %v3213_v39  ;;  %2610 = vmatprep.mubr.msk.bf16.mxu0 %vm2824_vm0, %v2823_v0 }
0x2e23   :  { %2608 = vmatprep.subr.bf16.mxu0 %v2823_v0 }
0x2e26   :  { %2609 = vmatpush3.bf16.msra.mxu0 %v3222_v40 }
0x2e27   :  { %2620 = vmatprep.subr.bf16.mxu0 %v2823_v0 }
0x2e29   :  { %2611 = vmatmul.mubr.msk.bf16.vlgmr.msra.gmra.mrb[56].mxu0 %vm84_vm1, %v1864_v14 }
0x2e2a   :  { %2621 = vmatpush3.bf16.msra.mxu0 %v3288_v48  ;;  %2628 = vmatprep.mubr.msk.bf16.mxu0 %vm2824_vm0, %v2823_v0 }
0x2e2b   :  { %2622 = vmatprep.subr.bf16.mxu0 %v2823_v0 }
0x2e2e   :  { %2623 = vmatpush3.bf16.msra.mxu0 %v3294_v49 }
0x2e2f   :  { %2624 = vmatprep.subr.bf16.mxu0 %v2823_v0 }
0x2e32   :  { %2625 = vmatpush3.bf16.msra.mxu0 %v3298_v33 }
0x2e33   :  { %2626 = vmatprep.subr.bf16.mxu0 %v2823_v0 }
0x2e36   :  { %2627 = vmatpush3.bf16.msra.mxu0 %v3302_v51 }
0x2ef4   :  { %v3376_v39 = vpop.f32.mrb[52].mxu0 }
0x2ef5   :  { %v2604_v40 = vpop.f32.mrb[53].mxu0 }
0x2ef6   :  { %v1905_v48 = vpop.f32.mrb[54].mxu0 }
0x2ef7   :  { %v2605_v16 = vpop.f32.mrb[55].mxu0 }
0x2ef8   :  { %v3406_v16 = vld [vmem:[%s3603_s5 + $0x1] sm:$0x1] }
0x2efc   :  { %v1971_v49 = vpop.f32.mrb[56].mxu0 }
0x2efd   :  { %v1977_v22 = vadd.f32 %v1971_v49, %v1936_v18  ;;  %v2612_v24 = vpop.f32.mrb[57].mxu0 }
0x2efe   :  { %v1974_v25 = vpop.f32.mrb[58].mxu0 }
0x2eff   :  { %v2613_v33 = vpop.f32.mrb[59].mxu0  ;;  %v1978_v2 = vsel %vm129_vm2, %v1977_v22, -inf }
0x2f00   :  { %1979 = vmax.xlane.f32.xlu1 %v1978_v2 }
0x2f8d   :  { %v1980_v51 = vpop.xlane.xlu1 %1979 }
0x2f8e   :  { %v1981_v30 = vsub.f32 %v1977_v22, %v1980_v51  ;;  %v3418_v22 = vadd.f32 %v3406_v16, %v3059_v9  ;;  %v3432_v9 = vadd.f32 %v3406_v16, %v3115_v15 }
0x2f90   :  { %v1982_v31 = vmul.f32 1.442695, %v1981_v30  ;;  %v628_v24 = vsel %vm368_vm5, %v3418_v22, -inf  ;;  %v3436_v30 = vadd.f32 %v3406_v16, %v3237_v43 }
0x2f92   :  { %2729 = vpow2.f32 %v1982_v31  ;;  %v3442_v31 = vadd.f32 %v3406_v16, %v3306_v52 }
0x2f94   :  { %v1652_v15 = vsel %vm368_vm5, %v3442_v31, -inf }
0x2f9c   :  { %v2730_v32 = vpop.eup %2729 }
0x2f9d   :  { %v1984_v35 = vsel %vm129_vm2, %v2730_v32, 0.0 }
0x2f9e   :  { %1985 = vadd.xlane.f32.xlu0 %v1984_v35 }
0x302b   :  { %v1986_v41 = vpop.xlane.xlu0 %1985 }
0x302c   :  { %2731 = vrcp.f32 %v1986_v41 }
0x3036   :  { %v2732_v37 = vpop.eup %2731 }
0x3037   :  { %v3383_v38 = vmul.f32 %v2732_v37, %v2730_v32  ;;  %v1396_v32 = vsel %vm368_vm5, %v3436_v30, -inf }
0x3039   :  { %v1989_v44 = vpack.c.bf16 %v3383_v38, %v3383_v38 }
0x303b   :  { %2617 = vmatmul.mubr.msk.bf16.vlgmr.msra.gmra.mrb[56].mxu1 %vm148_vm3, %v1989_v44 }
0x303c   :  { %2633 = vmatpush3.bf16.msra.mxu1 %v3321_v19  ;;  %2636 = vmatprep.mubr.msk.bf16.mxu1 %vm2824_vm0, %v2823_v0 }
0x303d   :  { %2634 = vmatprep.subr.bf16.mxu1 %v2823_v0 }
0x3040   :  { %2635 = vmatpush3.bf16.msra.mxu1 %v3330_v21 }
0x310e   :  { %v2027_v45 = vpop.f32.mrb[56].mxu1 }
0x310f   :  { %2034 = vrot.lane.b32.xlu0 %v2027_v45, %s2826_s30  ;;  %v2618_v27 = vpop.f32.mrb[57].mxu1 }
0x3110   :  { %v2030_v58 = vpop.f32.mrb[58].mxu1 }
0x3111   :  { %v2619_v47 = vpop.f32.mrb[59].mxu1 }
0x3181   :  { %v2035_v28 = vpop.permute.xlu0 %2034 }
0x3182   :  { %v2037_v53 = vadd.f32 %v2035_v28, %v1936_v18  ;;  %v3410_v18 = vadd.f32 %v3406_v16, %v3003_v6 }
0x3184   :  { %v2038_v54 = vmax.f32 %v2037_v53, 0.0  ;;  %v369_v49 = vsel %vm368_vm5, %v3410_v18, -inf }
0x3186   :  { %2040 = vrot.lane.b32.xlu1 %v2038_v54, %s2827_s8 }
0x31f8   :  { %v2041_v55 = vpop.permute.xlu1 %2040 }
0x31f9   :  { %v2043_v19 = vsel %vm84_vm1, %v2041_v55, %v3354_v57 }
0x31fa   :  { %v2044_v56 = vpack.c.bf16 %v2043_v19, %v2043_v19 }
0x31fc   :  { %2629 = vmatmul.mubr.msk.bf16.vlgmr.msra.gmra.mrb[60].mxu0 %vm236_vm4, %v2044_v56  ;;  %v3463_v56 = vadd.f32 %v3406_v16, %v3171_v1 }
0x32cf   :  { %v2082_v0 = vpop.f32.mrb[60].mxu0 }
0x32d0   :  { %v2083_v21 = vadd.f32 %v3346_v26, %v2082_v0  ;;  %v2630_v59 = vpop.f32.mrb[61].mxu0  ;;  %v3467_v0 = vadd.f32 %v3406_v16, %v3376_v39 }
0x32d1   :  { %v2085_v61 = vpop.f32.mrb[62].mxu0 }
0x32d2   :  { %2095 = vrot.lane.b32.xlu0 %v2083_v21, %s2828_s10  ;;  %2099 = vrot.lane.b32.xlu1 %v2083_v21, %s2825_s29  ;;  %v2631_v62 = vpop.f32.mrb[63].mxu0  ;;  %v2262_v63 = vmul.f32 -1.442695, %v2083_v21 }
0x32d4   :  { %2733 = vpow2.f32 %v2262_v63 }
0x32de   :  { %v2734_v4 = vpop.eup %2733 }
0x32df   :  { %v2091_v7 = vadd.f32 1.0, %v2734_v4 }
0x32e1   :  { %2735 = vrcp.f32 %v2091_v7 }
0x32eb   :  { %v2736_v8 = vpop.eup %2735 }
0x32ec   :  { %v2109_v6 = vsub.f32 1.0, %v2736_v8  ;;  %v2115_v33 = vmul.f32 %v2736_v8, %v3354_v57 }
0x3344   :  { %v2100_v10 = vpop.permute.xlu1 %2099  ;;  %v2096_v13 = vpop.permute.xlu0 %2095 }
0x3345   :  { %v2102_v11 = vmul.f32 %v2736_v8, %v2100_v10  ;;  %v2098_v14 = vsub.f32 %v2083_v21, %v2096_v13  ;;  %v1140_v21 = vsel %vm368_vm5, %v3463_v56, -inf }
0x3347   :  { %2104 = vrot.lane.b32.xlu1 %v2102_v11, %s2821_s15 }
0x33b9   :  { %v2105_v26 = vpop.permute.xlu1 %2104 }
0x33ba   :  { %v2107_v40 = vadd.f32 %v2105_v26, %v2098_v14 }
0x33bc   :  { %2737 = vtanh.f32 %v2107_v40 }
0x33c6   :  { %v2738_v48 = vpop.eup %2737 }
0x33c7   :  { %2111 = vrot.lane.b32.xlu0 %v2738_v48, %s2828_s10 }
0x33e6   :  { %370 = vmax.xlane.f32.xlu0 %v369_v49 }
0x33fc   :  { %383 = vrot.lane.b32.xlu0 %v2980_v3, %s2825_s29 }
0x341b   :  { %629 = vmax.xlane.f32.xlu0 %v628_v24 }
0x3431   :  { %642 = vrot.lane.b32.xlu0 %v3036_v5, %s2825_s29  ;;  %v884_v5 = vsel %vm368_vm5, %v3432_v9, -inf }
0x3439   :  { %v2112_v25 = vpop.permute.xlu0 %2111 }
0x343a   :  { %v2114_v2 = vmul.f32 %v2112_v25, %v2109_v6 }
0x343c   :  { %v3425_v51 = vadd.f32 %v2115_v33, %v2114_v2 }
0x343e   :  { %v2117_v3 = vpack.c.bf16 %v3425_v51, %v3425_v51 }
0x3440   :  { %2119 = vrot.lane.b32.xlu1 %v2117_v3, %s2828_s10 }
0x3450   :  { %885 = vmax.xlane.f32.xlu0 %v884_v5 }
0x3454   :  { %1397 = vmax.xlane.f32.xlu0 %v1396_v32 }
0x3458   :  { %1653 = vmax.xlane.f32.xlu0 %v1652_v15 }
0x3473   :  { %v371_v35 = vpop.xlane.xlu0 %370 }
0x3474   :  { %v372_v43 = vsub.f32 %v3410_v18, %v371_v35 }
0x3476   :  { %v373_v41 = vmul.f32 1.442695, %v372_v43 }
0x3477   :  { %v384_v52 = vpop.permute.xlu0 %383 }
0x3478   :  { %2739 = vpow2.f32 %v373_v41 }
0x3482   :  { %v2740_v37 = vpop.eup %2739 }
0x3483   :  { %v375_v44 = vsel %vm368_vm5, %v2740_v37, 0.0 }
0x3484   :  { %376 = vadd.xlane.f32.xlu1 %v375_v44 }
0x3495   :  { %387 = vrot.lane.b32.xlu1 %v2924_v20, %s2828_s10 }
0x34a8   :  { %v630_v45 = vpop.xlane.xlu0 %629 }
0x34a9   :  { %v631_v27 = vsub.f32 %v3418_v22, %v630_v45 }
0x34ab   :  { %v632_v58 = vmul.f32 1.442695, %v631_v27 }
0x34ac   :  { %v643_v54 = vpop.permute.xlu0 %642 }
0x34ad   :  { %2741 = vpow2.f32 %v632_v58 }
0x34b2   :  { %v2120_v47 = vpop.permute.xlu1 %2119 }
0x34b3   :  { %2637 = vmatmul.mubr.msk.bf16.vlgmr.msra.gmra.mrb[60].mxu1 %vm84_vm1, %v2120_v47 }
0x34b7   :  { %v2742_v28 = vpop.eup %2741 }
0x34b8   :  { %v634_v53 = vsel %vm368_vm5, %v2742_v28, 0.0 }
0x34b9   :  { %635 = vadd.xlane.f32.xlu1 %v634_v53 }
0x34ca   :  { %646 = vrot.lane.b32.xlu1 %v3010_v29, %s2828_s10  ;;  %v1908_v29 = vsel %vm368_vm5, %v3467_v0, -inf }
0x34dd   :  { %v3457_v55 = vpop.xlane.xlu0 %885 }
0x34de   :  { %v887_v20 = vsub.f32 %v3432_v9, %v3457_v55 }
0x34e0   :  { %v888_v19 = vmul.f32 1.442695, %v887_v20 }
0x34e2   :  { %2743 = vpow2.f32 %v888_v19 }
0x34ec   :  { %v2744_v59 = vpop.eup %2743 }
0x34ed   :  { %v890_v61 = vsel %vm368_vm5, %v2744_v59, 0.0 }
0x34ee   :  { %1141 = vmax.xlane.f32.xlu1 %v1140_v21 }
0x34f2   :  { %1909 = vmax.xlane.f32.xlu1 %v1908_v29 }
0x34f6   :  { %891 = vadd.xlane.f32.xlu1 %v890_v61 }
0x3507   :  { %902 = vrot.lane.b32.xlu1 %v3066_v34, %s2828_s10 }
0x3511   :  { %v377_v1 = vpop.xlane.xlu1 %376 }
0x3512   :  { %2745 = vlog2.f32 %v377_v1 }
0x3515   :  { %v388_v8 = vpop.permute.xlu1 %387 }
0x351c   :  { %v2746_v62 = vpop.eup %2745 }
0x351d   :  { %v379_v39 = vmul.f32 0.6931472, %v2746_v62 }
0x351f   :  { %v380_v63 = vadd.f32 %v379_v39, %v371_v35 }
0x3521   :  { %v381_v4 = vsub.f32 %v3410_v18, %v380_v63 }
0x3523   :  { %v391_v7 = vsel %vm390_vm6, %v381_v4, 0.0 }
0x3524   :  { %v392_v10 = vsel %vm236_vm4, %v391_v7, %v384_v52 }
0x3525   :  { %v394_v11 = vsel %vm393_vm7, %v392_v10, %v388_v8 }
0x3526   :  { %v396_v13 = vsel %vm395_vm8, %v394_v11, 0.0 }
0x3527   :  { %397 = vst [vmem:[%s3605_s7] sm:$0x1] %v396_v13 }
0x3546   :  { %v636_v34 = vpop.xlane.xlu1 %635 }
0x3547   :  { %2747 = vlog2.f32 %v636_v34 }
0x354a   :  { %v647_v49 = vpop.permute.xlu1 %646 }
0x3551   :  { %v2748_v14 = vpop.eup %2747 }
0x3552   :  { %v638_v26 = vmul.f32 0.6931472, %v2748_v14 }
0x3554   :  { %v639_v40 = vadd.f32 %v638_v26, %v630_v45 }
0x3556   :  { %v640_v48 = vsub.f32 %v3418_v22, %v639_v40 }
0x3558   :  { %v649_v18 = vsel %vm390_vm6, %v640_v48, 0.0 }
0x3559   :  { %v650_v24 = vsel %vm236_vm4, %v649_v18, %v643_v54 }
0x355a   :  { %v651_v6 = vsel %vm393_vm7, %v650_v24, %v647_v49 }
0x355b   :  { %v652_v25 = vsel %vm395_vm8, %v651_v6, 0.0 }
0x355c   :  { %653 = vst [vmem:[%s3605_s7 + $0x1] sm:$0x1] %v652_v25 }
0x357b   :  { %v3492_v33 = vpop.xlane.xlu1 %1141 }
0x357c   :  { %v1143_v2 = vsub.f32 %v3463_v56, %v3492_v33 }
0x357e   :  { %v1144_v3 = vmul.f32 1.442695, %v1143_v2 }
0x3580   :  { %2749 = vpow2.f32 %v1144_v3 }
0x3586   :  { %v2158_v22 = vpop.f32.mrb[60].mxu1 }
0x3587   :  { %v3497_v5 = vadd.f32 %v3406_v16, %v2158_v22  ;;  %v2638_v32 = vpop.f32.mrb[61].mxu1  ;;  %v3516_v16 = vpop.xlane.xlu0 %1397 }
0x3588   :  { %v2161_v15 = vpop.f32.mrb[62].mxu1 }
0x3589   :  { %v2639_v35 = vpop.f32.mrb[63].mxu1  ;;  %v2164_v43 = vsel %vm368_vm5, %v3497_v5, -inf }
0x358a   :  { %v2750_v41 = vpop.eup %2749  ;;  %2165 = vmax.xlane.f32.xlu0 %v2164_v43 }
0x358b   :  { %v1146_v37 = vsel %vm368_vm5, %v2750_v41, 0.0 }
0x358c   :  { %1147 = vadd.xlane.f32.xlu1 %v1146_v37 }
0x359d   :  { %1410 = vrot.lane.b32.xlu1 %v3204_v36, %s2825_s29 }
0x35a0   :  { %898 = vrot.lane.b32.xlu0 %v3092_v12, %s2825_s29  ;;  %v1399_v12 = vsub.f32 %v3436_v30, %v3516_v16 }
0x35a1   :  { %1666 = vrot.lane.b32.xlu1 %v3275_v46, %s2825_s29  ;;  %v3530_v46 = vpop.xlane.xlu1 %1909 }
0x35a2   :  { %v1400_v36 = vmul.f32 1.442695, %v1399_v12 }
0x35a4   :  { %1154 = vrot.lane.b32.xlu0 %v3148_v23, %s2825_s29  ;;  %v3524_v23 = vpop.xlane.xlu0 %1653  ;;  %2751 = vpow2.f32 %v1400_v36 }
0x35a5   :  { %1922 = vrot.lane.b32.xlu1 %v3354_v57, %s2825_s29  ;;  %v892_v58 = vpop.xlane.xlu1 %891 }
0x35a8   :  { %1158 = vrot.lane.b32.xlu0 %v3122_v42, %s2828_s10  ;;  %v1655_v42 = vsub.f32 %v3442_v31, %v3524_v23 }
0x35a9   :  { %2178 = vrot.lane.b32.xlu1 %v3425_v51, %s2825_s29  ;;  %v903_v54 = vpop.permute.xlu1 %902 }
0x35aa   :  { %v1656_v57 = vmul.f32 1.442695, %v1655_v42 }
0x35ac   :  { %2753 = vpow2.f32 %v1656_v57 }
0x35ad   :  { %1670 = vrot.lane.b32.xlu1 %v3244_v60, %s2828_s10  ;;  %v1911_v60 = vsub.f32 %v3467_v0, %v3530_v46 }
0x35af   :  { %v1912_v51 = vmul.f32 1.442695, %v1911_v60 }
0x35b1   :  { %1926 = vrot.lane.b32.xlu1 %v3313_v17, %s2828_s10  ;;  %2755 = vpow2.f32 %v1912_v51  ;;  %v2752_v17 = vpop.eup %2751 }
0x35b2   :  { %v1402_v44 = vsel %vm368_vm5, %v2752_v17, 0.0  ;;  %2757 = vlog2.f32 %v892_v58 }
0x35b5   :  { %2182 = vrot.lane.b32.xlu1 %v3383_v38, %s2828_s10 }
0x35b6   :  { %v2754_v52 = vpop.eup %2753 }
0x35b7   :  { %v1658_v45 = vsel %vm368_vm5, %v2754_v52, 0.0 }
0x35bb   :  { %v2756_v27 = vpop.eup %2755 }
0x35bc   :  { %v1914_v38 = vsel %vm368_vm5, %v2756_v27, 0.0  ;;  %v2758_v47 = vpop.eup %2757 }
0x35bd   :  { %v894_v28 = vmul.f32 0.6931472, %v2758_v47 }
0x35bf   :  { %v895_v53 = vadd.f32 %v894_v28, %v3457_v55 }
0x35c1   :  { %v896_v19 = vsub.f32 %v3432_v9, %v895_v53 }
0x35c3   :  { %v905_v61 = vsel %vm390_vm6, %v896_v19, 0.0 }
0x35c7   :  { %1403 = vadd.xlane.f32.xlu0 %v1402_v44 }
0x35cb   :  { %1659 = vadd.xlane.f32.xlu0 %v1658_v45 }
0x35cf   :  { %1915 = vadd.xlane.f32.xlu0 %v1914_v38 }
0x3617   :  { %v3538_v20 = vpop.xlane.xlu0 %2165 }
0x3618   :  { %v2167_v21 = vsub.f32 %v3497_v5, %v3538_v20 }
0x3619   :  { %v1148_v29 = vpop.xlane.xlu1 %1147 }
0x361a   :  { %v2168_v59 = vmul.f32 1.442695, %v2167_v21  ;;  %2759 = vlog2.f32 %v1148_v29 }
0x361b   :  { %v899_v1 = vpop.permute.xlu0 %898 }
0x361c   :  { %2761 = vpow2.f32 %v2168_v59  ;;  %v906_v62 = vsel %vm236_vm4, %v905_v61, %v899_v1 }
0x361d   :  { %v907_v39 = vsel %vm393_vm7, %v906_v62, %v903_v54  ;;  %v1411_v48 = vpop.permute.xlu1 %1410 }
0x361e   :  { %v908_v55 = vsel %vm395_vm8, %v907_v39, 0.0 }
0x361f   :  { %909 = vst [vmem:[%s3605_s7 + $0x2] sm:$0x1] %v908_v55  ;;  %v1155_v7 = vpop.permute.xlu0 %1154 }
0x3621   :  { %v1667_v49 = vpop.permute.xlu1 %1666 }
0x3623   :  { %v1159_v14 = vpop.permute.xlu0 %1158 }
0x3624   :  { %v2760_v9 = vpop.eup %2759 }
0x3625   :  { %v1150_v63 = vmul.f32 0.6931472, %v2760_v9  ;;  %v1923_v6 = vpop.permute.xlu1 %1922 }
0x3626   :  { %v2762_v4 = vpop.eup %2761 }
0x3627   :  { %v1151_v8 = vadd.f32 %v1150_v63, %v3492_v33  ;;  %v2170_v10 = vsel %vm368_vm5, %v2762_v4, 0.0 }
0x3628   :  { %2171 = vadd.xlane.f32.xlu0 %v2170_v10 }
0x3629   :  { %v1152_v11 = vsub.f32 %v3463_v56, %v1151_v8  ;;  %v2179_v33 = vpop.permute.xlu1 %2178 }
0x362b   :  { %v1161_v13 = vsel %vm390_vm6, %v1152_v11, 0.0 }
0x362c   :  { %v1162_v34 = vsel %vm236_vm4, %v1161_v13, %v1155_v7 }
0x362d   :  { %v1163_v26 = vsel %vm393_vm7, %v1162_v34, %v1159_v14  ;;  %v1671_v35 = vpop.permute.xlu1 %1670 }
0x362e   :  { %v1164_v40 = vsel %vm395_vm8, %v1163_v26, 0.0 }
0x362f   :  { %1165 = vst [vmem:[%s3605_s7 + $0x3] sm:$0x1] %v1164_v40 }
0x363e   :  { %1414 = vrot.lane.b32.xlu0 %v3178_v50, %s2828_s10 }
0x3654   :  { %v1404_v18 = vpop.xlane.xlu0 %1403 }
0x3658   :  { %v1660_v56 = vpop.xlane.xlu0 %1659 }
0x3659   :  { %2763 = vlog2.f32 %v1660_v56 }
0x365c   :  { %v1916_v24 = vpop.xlane.xlu0 %1915 }
0x365d   :  { %2765 = vlog2.f32 %v1916_v24 }
0x365e   :  { %2767 = vlog2.f32 %v1404_v18 }
0x3663   :  { %v2764_v25 = vpop.eup %2763 }
0x3664   :  { %v1662_v2 = vmul.f32 0.6931472, %v2764_v25 }
0x3666   :  { %v1663_v3 = vadd.f32 %v1662_v2, %v3524_v23  ;;  %v1927_v23 = vpop.permute.xlu1 %1926 }
0x3667   :  { %v2766_v22 = vpop.eup %2765 }
0x3668   :  { %v1664_v32 = vsub.f32 %v3442_v31, %v1663_v3  ;;  %v1918_v15 = vmul.f32 0.6931472, %v2766_v22 }
0x366a   :  { %v1673_v50 = vsel %vm390_vm6, %v1664_v32, 0.0  ;;  %v1919_v43 = vadd.f32 %v1918_v15, %v3530_v46  ;;  %v2183_v54 = vpop.permute.xlu1 %2182 }
0x366b   :  { %v1674_v41 = vsel %vm236_vm4, %v1673_v50, %v1667_v49 }
0x366c   :  { %v1675_v37 = vsel %vm393_vm7, %v1674_v41, %v1671_v35  ;;  %v1920_v12 = vsub.f32 %v3467_v0, %v1919_v43  ;;  %v2768_v0 = vpop.eup %2767 }
0x366d   :  { %v1676_v36 = vsel %vm395_vm8, %v1675_v37, 0.0  ;;  %v1406_v60 = vmul.f32 0.6931472, %v2768_v0 }
0x366e   :  { %1677 = vst [vmem:[%s3605_s7 + $0x5] sm:$0x1] %v1676_v36  ;;  %v1929_v31 = vsel %vm390_vm6, %v1920_v12, 0.0 }
0x366f   :  { %v1930_v42 = vsel %vm236_vm4, %v1929_v31, %v1923_v6  ;;  %v1407_v51 = vadd.f32 %v1406_v60, %v3516_v16 }
0x3670   :  { %v1931_v57 = vsel %vm393_vm7, %v1930_v42, %v1927_v23 }
0x3671   :  { %v1932_v46 = vsel %vm395_vm8, %v1931_v57, 0.0  ;;  %v1408_v17 = vsub.f32 %v3436_v30, %v1407_v51 }
0x3672   :  { %1933 = vst [vmem:[%s3605_s7 + $0x6] sm:$0x1] %v1932_v46 }
0x3673   :  { %v1417_v52 = vsel %vm390_vm6, %v1408_v17, 0.0 }
0x3674   :  { %v1418_v45 = vsel %vm236_vm4, %v1417_v52, %v1411_v48 }
0x36b5   :  { %v2172_v44 = vpop.xlane.xlu0 %2171 }
0x36b6   :  { %2769 = vlog2.f32 %v2172_v44 }
0x36b9   :  { %v1415_v27 = vpop.permute.xlu0 %1414 }
0x36ba   :  { %v1419_v38 = vsel %vm393_vm7, %v1418_v45, %v1415_v27 }
0x36bb   :  { %v1420_v58 = vsel %vm395_vm8, %v1419_v38, 0.0 }
0x36bc   :  { %1421 = vst [vmem:[%s3605_s7 + $0x4] sm:$0x1] %v1420_v58 }
0x36c0   :  { %v2770_v47 = vpop.eup %2769 }
0x36c1   :  { %v2174_v28 = vmul.f32 0.6931472, %v2770_v47 }
0x36c3   :  { %v2175_v16 = vadd.f32 %v2174_v28, %v3538_v20 }
0x36c5   :  { %v2176_v30 = vsub.f32 %v3497_v5, %v2175_v16 }
0x36c7   :  { %v2185_v53 = vsel %vm390_vm6, %v2176_v30, 0.0 }
0x36c8   :  { %v2186_v19 = vsel %vm236_vm4, %v2185_v53, %v2179_v33 }
0x36c9   :  { %v2187_v21 = vsel %vm393_vm7, %v2186_v19, %v2183_v54 }
0x36ca   :  { %v2188_v29 = vsel %vm395_vm8, %v2187_v21, 0.0 }
0x36cb   :  { %2189 = vst [vmem:[%s3605_s7 + $0x7] sm:$0x1] %v2188_v29 }
0x36cc   :  { %2194 = vsyncpa [#allocation5], 1 }

</bundles_post_ra>
